<compile_context>
chip_gen: v7x
topology: tpu7x:2x2x1
jax: 0.10.0
libtpu: 0.0.40
codegen_flags: <defaults>
</compile_context>

<pallas_src>
import jax
import jax.numpy as jnp
from jax.experimental import pallas as pl
from jax.experimental.pallas import tpu as pltpu


def rnn_step_kernel(idx_ref,                # SMEM  [B] int32   (scalar prefetch)
                    embed_hbm,              # HBM   [V, H] f32  (memory_space=pl.ANY)
                    w_ref,                  # VMEM  [1, 2H, 4H] bf16  (this layer, fused W_ih;W_hh)
                    b_ref,                  # VMEM  [1, 1, 4H]  f32   (b_ih + b_hh)
                    h0_ref, c0_ref,         # VMEM  [1, B, H]   f32   (this layer's state)
                    fcw_ref, fcb_ref,       # VMEM  [H, O] bf16, [1, O] f32 (resident)
                    out_ref,                # VMEM  [B, O] f32
                    h_out_ref, c_out_ref,   # VMEM  [1, B, H] f32
                    x_ref,                  # VMEM scratch [B, H] f32 (layer input, persists across grid)
                    sem):                   # DMA semaphores (B,)
    l = pl.program_id(0)
    n_layers = pl.num_programs(0)
    B, H = x_ref.shape
    V = embed_hbm.shape[0]

    # ---- Layer 0: gather the B embedding rows straight from HBM ----
    @pl.when(l == 0)
    def _():
        for i in range(B):                                   # static B, unrolled
            tok = jnp.clip(idx_ref[i], 0, V - 1)             # guard out-of-range ids
            pltpu.make_async_copy(embed_hbm.at[tok], x_ref.at[i], sem.at[i]).start()
        for i in range(B):
            pltpu.make_async_copy(embed_hbm.at[0], x_ref.at[i], sem.at[i]).wait()

    # ---- One LSTM layer (single time step), PyTorch gate order i, f, g, o ----
    x = x_ref[...]                                           # [B, H] f32
    h = h0_ref[0]                                            # [B, H] f32
    c = c0_ref[0]                                            # [B, H] f32
    xh = jnp.concatenate([x, h], axis=1)                     # [B, 2H]
    gates = (jnp.dot(xh.astype(jnp.bfloat16), w_ref[0],      # single fused MXU matmul
                     preferred_element_type=jnp.float32)
             + b_ref[0])                                     # [B, 4H] f32
    i_g = jax.nn.sigmoid(gates[:, 0 * H:1 * H])
    f_g = jax.nn.sigmoid(gates[:, 1 * H:2 * H])
    g_g = jnp.tanh(gates[:, 2 * H:3 * H])
    o_g = jax.nn.sigmoid(gates[:, 3 * H:4 * H])
    c_new = f_g * c + i_g * g_g
    h_new = o_g * jnp.tanh(c_new)
    h_out_ref[0] = h_new
    c_out_ref[0] = c_new
    x_ref[...] = h_new                                       # carry to next layer
    # TODO(synk): inter-layer dropout of nn.LSTM omitted (eval-mode / inference semantics).

    # ---- Final fully connected layer on the last layer's hidden state ----
    @pl.when(l == n_layers - 1)
    def _():
        out_ref[...] = (jnp.dot(h_new.astype(jnp.bfloat16), fcw_ref[...],
                                preferred_element_type=jnp.float32)
                        + fcb_ref[...])


def rnn_forward(idx, params, hidden, cell):
    """idx: int32 [B] token ids; hidden/cell: f32 [L, B, H]."""
    embed_w, w, b, fcw, fcb = params
    B = idx.shape[0]
    L, _, H = hidden.shape
    O = fcw.shape[1]

    grid_spec = pltpu.PrefetchScalarGridSpec(
        num_scalar_prefetch=1,                     # idx -> SMEM
        grid=(L,),                                 # one grid step per LSTM layer
        in_specs=[
            pl.BlockSpec(memory_space=pl.ANY),                            # embed table stays in HBM
            pl.BlockSpec((1, 2 * H, 4 * H), lambda l, idx: (l, 0, 0)),    # fused W for layer l
            pl.BlockSpec((1, 1, 4 * H), lambda l, idx: (l, 0, 0)),        # bias for layer l
            pl.BlockSpec((1, B, H), lambda l, idx: (l, 0, 0)),            # h0[l]
            pl.BlockSpec((1, B, H), lambda l, idx: (l, 0, 0)),            # c0[l]
            pl.BlockSpec((H, O), lambda l, idx: (0, 0)),                  # fc weight (resident)
            pl.BlockSpec((1, O), lambda l, idx: (0, 0)),                  # fc bias (resident)
        ],
        out_specs=(
            pl.BlockSpec((B, O), lambda l, idx: (0, 0)),                  # logits (written at last layer)
            pl.BlockSpec((1, B, H), lambda l, idx: (l, 0, 0)),            # new hidden[l]
            pl.BlockSpec((1, B, H), lambda l, idx: (l, 0, 0)),            # new cell[l]
        ),
        scratch_shapes=[
            pltpu.VMEM((B, H), jnp.float32),       # running layer input x (persists across layers)
            pltpu.SemaphoreType.DMA((B,)),         # embedding-row gather semaphores
        ],
    )
    out_shapes = (
        jax.ShapeDtypeStruct((B, O), jnp.float32),
        jax.ShapeDtypeStruct((L, B, H), jnp.float32),
        jax.ShapeDtypeStruct((L, B, H), jnp.float32),
    )
    return pl.pallas_call(
        rnn_step_kernel,
        out_shape=out_shapes,
        grid_spec=grid_spec,
        compiler_params=pltpu.CompilerParams(
            # Layers are sequential (x carried through scratch) -> arbitrary.
            # TODO(synk): at real sizes, add a parallel batch/N axis so v7x can use both TCs,
            # and a timestep loop so weights are loaded once per sequence, not per token.
            dimension_semantics=("arbitrary",),
            vmem_limit_bytes=32 * 1024 * 1024,
        ),
    )(idx.astype(jnp.int32), embed_w, w, b, hidden, cell, fcw, fcb)


def init_params(key, vocab, hidden, layers, out_size):
    ks = jax.random.split(key, 5)
    s = 0.1
    embed_w = s * jax.random.normal(ks[0], (vocab, hidden), jnp.float32)
    # Fused LSTM weights: concat(W_ih^T, W_hh^T) per layer -> [2H, 4H], gate order i,f,g,o.
    w = (s * jax.random.normal(ks[1], (layers, 2 * hidden, 4 * hidden), jnp.float32)
         ).astype(jnp.bfloat16)
    b = s * jax.random.normal(ks[2], (layers, 1, 4 * hidden), jnp.float32)   # b_ih + b_hh combined
    fcw = (s * jax.random.normal(ks[3], (hidden, out_size), jnp.float32)).astype(jnp.bfloat16)
    fcb = s * jax.random.normal(ks[4], (1, out_size), jnp.float32)
    return embed_w, w, b, fcw, fcb


def rnn_reference(idx, params, hidden, cell):
    """Pure-JAX reference mirroring the PyTorch forward (eval mode), bf16 weights."""
    embed_w, w, b, fcw, fcb = params
    x = embed_w[idx]                                    # [B, H] f32
    L, _, H = hidden.shape
    h_out, c_out = [], []
    for l in range(L):
        xh = jnp.concatenate([x, hidden[l]], axis=1)
        gates = jnp.dot(xh.astype(jnp.bfloat16), w[l],
                        preferred_element_type=jnp.float32) + b[l]
        i = jax.nn.sigmoid(gates[:, 0 * H:1 * H])
        f = jax.nn.sigmoid(gates[:, 1 * H:2 * H])
        g = jnp.tanh(gates[:, 2 * H:3 * H])
        o = jax.nn.sigmoid(gates[:, 3 * H:4 * H])
        c_new = f * cell[l] + i * g
        h_new = o * jnp.tanh(c_new)
        h_out.append(h_new)
        c_out.append(c_new)
        x = h_new
    out = jnp.dot(x.astype(jnp.bfloat16), fcw, preferred_element_type=jnp.float32) + fcb
    return out, jnp.stack(h_out), jnp.stack(c_out)


if __name__ == "__main__":
    # Lane/sublane-dense demo shapes: H, OUT multiples of 128; B >= 8 (f32 sublane).
    VOCAB, HIDDEN, LAYERS, OUT, BATCH = 128, 128, 2, 128, 8

    key = jax.random.PRNGKey(0)
    k_params, k_idx, k_h, k_c = jax.random.split(key, 4)

    params = init_params(k_params, VOCAB, HIDDEN, LAYERS, OUT)
    idx = jax.random.randint(k_idx, (BATCH,), 0, VOCAB, dtype=jnp.int32)
    hidden = 0.1 * jax.random.normal(k_h, (LAYERS, BATCH, HIDDEN), jnp.float32)
    cell = 0.1 * jax.random.normal(k_c, (LAYERS, BATCH, HIDDEN), jnp.float32)

    out, h_new, c_new = rnn_forward(idx, params, hidden, cell)
    jax.block_until_ready((out, h_new, c_new))

    # Sanity check against a pure-JAX reference (same bf16 weights, f32 accumulation).
    out_r, h_r, c_r = rnn_reference(idx, params, hidden, cell)
    assert jnp.allclose(out, out_r, atol=2e-3, rtol=2e-3), float(jnp.max(jnp.abs(out - out_r)))
    assert jnp.allclose(h_new, h_r, atol=2e-3, rtol=2e-3), float(jnp.max(jnp.abs(h_new - h_r)))
    assert jnp.allclose(c_new, c_r, atol=2e-3, rtol=2e-3), float(jnp.max(jnp.abs(c_new - c_r)))

    print("KERNEL_OK")
</pallas_src>

<mosaic_0001>
module attributes {stable_mosaic.version = 11 : i64} {
  func.func @rnn_step_kernel(%arg0: i32, %arg1: memref<8xi32, #tpu.memory_space<smem>>, %arg2: memref<128x128xf32, #tpu.memory_space<any>>, %arg3: memref<1x256x512xbf16, #tpu.memory_space<vmem>>, %arg4: memref<1x1x512xf32, #tpu.memory_space<vmem>>, %arg5: memref<1x8x128xf32, #tpu.memory_space<vmem>>, %arg6: memref<1x8x128xf32, #tpu.memory_space<vmem>>, %arg7: memref<128x128xbf16, #tpu.memory_space<vmem>>, %arg8: memref<1x128xf32, #tpu.memory_space<vmem>>, %arg9: memref<8x128xf32, #tpu.memory_space<vmem>>, %arg10: memref<1x8x128xf32, #tpu.memory_space<vmem>>, %arg11: memref<1x8x128xf32, #tpu.memory_space<vmem>>, %arg12: memref<8x128xf32, #tpu.memory_space<vmem>>, %arg13: memref<8x!tpu.dma_semaphore, #tpu.memory_space<semaphore_mem>>) attributes {dimension_semantics = [#tpu.dimension_semantics<arbitrary>], iteration_bounds = array<i64: 2>, scalar_prefetch = 1 : i64, scratch_operands = 2 : i64, tpu.core_type = #tpu.core_type<tc>, window_params = [{}, {transform_indices = @transform_1, window_bounds = array<i64: 1, 256, 512>}, {transform_indices = @transform_2, window_bounds = array<i64: 1, 1, 512>}, {transform_indices = @transform_3, window_bounds = array<i64: 1, 8, 128>}, {transform_indices = @transform_4, window_bounds = array<i64: 1, 8, 128>}, {pipeline_mode = #tpu.pipeline_mode<synchronous>, transform_indices = @transform_5, window_bounds = array<i64: 128, 128>}, {pipeline_mode = #tpu.pipeline_mode<synchronous>, transform_indices = @transform_6, window_bounds = array<i64: 1, 128>}, {pipeline_mode = #tpu.pipeline_mode<synchronous>, transform_indices = @transform_7, window_bounds = array<i64: 8, 128>}, {transform_indices = @transform_8, window_bounds = array<i64: 1, 8, 128>}, {transform_indices = @transform_9, window_bounds = array<i64: 1, 8, 128>}]} {
    %c0_i32 = arith.constant 0 : i32
    %0 = arith.cmpi eq, %arg0, %c0_i32 : i32
    %1 = arith.extui %0 : i1 to i32
    %c0_i32_0 = arith.constant 0 : i32
    %2 = arith.cmpi ne, %1, %c0_i32_0 : i32
    scf.if %2 {
      %c0_26 = arith.constant 0 : index
      %52 = memref.load %arg1[%c0_26] : memref<8xi32, #tpu.memory_space<smem>>
      %c0_i32_27 = arith.constant 0 : i32
      %c127_i32 = arith.constant 127 : i32
      %53 = arith.maxsi %c0_i32_27, %52 : i32
      %54 = arith.minsi %c127_i32, %53 : i32
      %c0_i32_28 = arith.constant 0 : i32
      %c0_i32_29 = arith.constant 0 : i32
      %c0_i32_30 = arith.constant 0 : i32
      %55 = tpu.memref_slice %arg2[%54, %c0_i32_30] : memref<128x128xf32, #tpu.memory_space<any>> -> memref<1x128xf32, #tpu.memory_space<any>>
      %56 = tpu.memref_squeeze %55 : memref<1x128xf32, #tpu.memory_space<any>> -> memref<128xf32, #tpu.memory_space<any>>
      %c0_i32_31 = arith.constant 0 : i32
      %57 = tpu.memref_slice %arg12[%c0_i32_28, %c0_i32_31] : memref<8x128xf32, #tpu.memory_space<vmem>> -> memref<1x128xf32, #tpu.memory_space<vmem>>
      %58 = tpu.memref_squeeze %57 : memref<1x128xf32, #tpu.memory_space<vmem>> -> memref<128xf32, #tpu.memory_space<vmem>>
      %59 = tpu.memref_slice %arg13[%c0_i32_29] : memref<8x!tpu.dma_semaphore, #tpu.memory_space<semaphore_mem>> -> memref<1x!tpu.dma_semaphore, #tpu.memory_space<semaphore_mem>>
      %60 = tpu.memref_squeeze %59 : memref<1x!tpu.dma_semaphore, #tpu.memory_space<semaphore_mem>> -> memref<!tpu.dma_semaphore, #tpu.memory_space<semaphore_mem>>
      tpu.enqueue_dma source(%56 : memref<128xf32, #tpu.memory_space<any>>) target(%58 : memref<128xf32, #tpu.memory_space<vmem>>) target_semaphore(%60 : memref<!tpu.dma_semaphore, #tpu.memory_space<semaphore_mem>>)
      %c1 = arith.constant 1 : index
      %61 = memref.load %arg1[%c1] : memref<8xi32, #tpu.memory_space<smem>>
      %c0_i32_32 = arith.constant 0 : i32
      %c127_i32_33 = arith.constant 127 : i32
      %62 = arith.maxsi %c0_i32_32, %61 : i32
      %63 = arith.minsi %c127_i32_33, %62 : i32
      %c1_i32_34 = arith.constant 1 : i32
      %c1_i32_35 = arith.constant 1 : i32
      %c0_i32_36 = arith.constant 0 : i32
      %64 = tpu.memref_slice %arg2[%63, %c0_i32_36] : memref<128x128xf32, #tpu.memory_space<any>> -> memref<1x128xf32, #tpu.memory_space<any>>
      %65 = tpu.memref_squeeze %64 : memref<1x128xf32, #tpu.memory_space<any>> -> memref<128xf32, #tpu.memory_space<any>>
      %c0_i32_37 = arith.constant 0 : i32
      %66 = tpu.memref_slice %arg12[%c1_i32_34, %c0_i32_37] : memref<8x128xf32, #tpu.memory_space<vmem>> -> memref<1x128xf32, #tpu.memory_space<vmem>>
      %67 = tpu.memref_squeeze %66 : memref<1x128xf32, #tpu.memory_space<vmem>> -> memref<128xf32, #tpu.memory_space<vmem>>
      %68 = tpu.memref_slice %arg13[%c1_i32_35] : memref<8x!tpu.dma_semaphore, #tpu.memory_space<semaphore_mem>> -> memref<1x!tpu.dma_semaphore, #tpu.memory_space<semaphore_mem>>
      %69 = tpu.memref_squeeze %68 : memref<1x!tpu.dma_semaphore, #tpu.memory_space<semaphore_mem>> -> memref<!tpu.dma_semaphore, #tpu.memory_space<semaphore_mem>>
      tpu.enqueue_dma source(%65 : memref<128xf32, #tpu.memory_space<any>>) target(%67 : memref<128xf32, #tpu.memory_space<vmem>>) target_semaphore(%69 : memref<!tpu.dma_semaphore, #tpu.memory_space<semaphore_mem>>)
      %c2 = arith.constant 2 : index
      %70 = memref.load %arg1[%c2] : memref<8xi32, #tpu.memory_space<smem>>
      %c0_i32_38 = arith.constant 0 : i32
      %c127_i32_39 = arith.constant 127 : i32
      %71 = arith.maxsi %c0_i32_38, %70 : i32
      %72 = arith.minsi %c127_i32_39, %71 : i32
      %c2_i32 = arith.constant 2 : i32
      %c2_i32_40 = arith.constant 2 : i32
      %c0_i32_41 = arith.constant 0 : i32
      %73 = tpu.memref_slice %arg2[%72, %c0_i32_41] : memref<128x128xf32, #tpu.memory_space<any>> -> memref<1x128xf32, #tpu.memory_space<any>>
      %74 = tpu.memref_squeeze %73 : memref<1x128xf32, #tpu.memory_space<any>> -> memref<128xf32, #tpu.memory_space<any>>
      %c0_i32_42 = arith.constant 0 : i32
      %75 = tpu.memref_slice %arg12[%c2_i32, %c0_i32_42] : memref<8x128xf32, #tpu.memory_space<vmem>> -> memref<1x128xf32, #tpu.memory_space<vmem>>
      %76 = tpu.memref_squeeze %75 : memref<1x128xf32, #tpu.memory_space<vmem>> -> memref<128xf32, #tpu.memory_space<vmem>>
      %77 = tpu.memref_slice %arg13[%c2_i32_40] : memref<8x!tpu.dma_semaphore, #tpu.memory_space<semaphore_mem>> -> memref<1x!tpu.dma_semaphore, #tpu.memory_space<semaphore_mem>>
      %78 = tpu.memref_squeeze %77 : memref<1x!tpu.dma_semaphore, #tpu.memory_space<semaphore_mem>> -> memref<!tpu.dma_semaphore, #tpu.memory_space<semaphore_mem>>
      tpu.enqueue_dma source(%74 : memref<128xf32, #tpu.memory_space<any>>) target(%76 : memref<128xf32, #tpu.memory_space<vmem>>) target_semaphore(%78 : memref<!tpu.dma_semaphore, #tpu.memory_space<semaphore_mem>>)
      %c3 = arith.constant 3 : index
      %79 = memref.load %arg1[%c3] : memref<8xi32, #tpu.memory_space<smem>>
      %c0_i32_43 = arith.constant 0 : i32
      %c127_i32_44 = arith.constant 127 : i32
      %80 = arith.maxsi %c0_i32_43, %79 : i32
      %81 = arith.minsi %c127_i32_44, %80 : i32
      %c3_i32 = arith.constant 3 : i32
      %c3_i32_45 = arith.constant 3 : i32
      %c0_i32_46 = arith.constant 0 : i32
      %82 = tpu.memref_slice %arg2[%81, %c0_i32_46] : memref<128x128xf32, #tpu.memory_space<any>> -> memref<1x128xf32, #tpu.memory_space<any>>
      %83 = tpu.memref_squeeze %82 : memref<1x128xf32, #tpu.memory_space<any>> -> memref<128xf32, #tpu.memory_space<any>>
      %c0_i32_47 = arith.constant 0 : i32
      %84 = tpu.memref_slice %arg12[%c3_i32, %c0_i32_47] : memref<8x128xf32, #tpu.memory_space<vmem>> -> memref<1x128xf32, #tpu.memory_space<vmem>>
      %85 = tpu.memref_squeeze %84 : memref<1x128xf32, #tpu.memory_space<vmem>> -> memref<128xf32, #tpu.memory_space<vmem>>
      %86 = tpu.memref_slice %arg13[%c3_i32_45] : memref<8x!tpu.dma_semaphore, #tpu.memory_space<semaphore_mem>> -> memref<1x!tpu.dma_semaphore, #tpu.memory_space<semaphore_mem>>
      %87 = tpu.memref_squeeze %86 : memref<1x!tpu.dma_semaphore, #tpu.memory_space<semaphore_mem>> -> memref<!tpu.dma_semaphore, #tpu.memory_space<semaphore_mem>>
      tpu.enqueue_dma source(%83 : memref<128xf32, #tpu.memory_space<any>>) target(%85 : memref<128xf32, #tpu.memory_space<vmem>>) target_semaphore(%87 : memref<!tpu.dma_semaphore, #tpu.memory_space<semaphore_mem>>)
      %c4 = arith.constant 4 : index
      %88 = memref.load %arg1[%c4] : memref<8xi32, #tpu.memory_space<smem>>
      %c0_i32_48 = arith.constant 0 : i32
      %c127_i32_49 = arith.constant 127 : i32
      %89 = arith.maxsi %c0_i32_48, %88 : i32
      %90 = arith.minsi %c127_i32_49, %89 : i32
      %c4_i32 = arith.constant 4 : i32
      %c4_i32_50 = arith.constant 4 : i32
      %c0_i32_51 = arith.constant 0 : i32
      %91 = tpu.memref_slice %arg2[%90, %c0_i32_51] : memref<128x128xf32, #tpu.memory_space<any>> -> memref<1x128xf32, #tpu.memory_space<any>>
      %92 = tpu.memref_squeeze %91 : memref<1x128xf32, #tpu.memory_space<any>> -> memref<128xf32, #tpu.memory_space<any>>
      %c0_i32_52 = arith.constant 0 : i32
      %93 = tpu.memref_slice %arg12[%c4_i32, %c0_i32_52] : memref<8x128xf32, #tpu.memory_space<vmem>> -> memref<1x128xf32, #tpu.memory_space<vmem>>
      %94 = tpu.memref_squeeze %93 : memref<1x128xf32, #tpu.memory_space<vmem>> -> memref<128xf32, #tpu.memory_space<vmem>>
      %95 = tpu.memref_slice %arg13[%c4_i32_50] : memref<8x!tpu.dma_semaphore, #tpu.memory_space<semaphore_mem>> -> memref<1x!tpu.dma_semaphore, #tpu.memory_space<semaphore_mem>>
      %96 = tpu.memref_squeeze %95 : memref<1x!tpu.dma_semaphore, #tpu.memory_space<semaphore_mem>> -> memref<!tpu.dma_semaphore, #tpu.memory_space<semaphore_mem>>
      tpu.enqueue_dma source(%92 : memref<128xf32, #tpu.memory_space<any>>) target(%94 : memref<128xf32, #tpu.memory_space<vmem>>) target_semaphore(%96 : memref<!tpu.dma_semaphore, #tpu.memory_space<semaphore_mem>>)
      %c5 = arith.constant 5 : index
      %97 = memref.load %arg1[%c5] : memref<8xi32, #tpu.memory_space<smem>>
      %c0_i32_53 = arith.constant 0 : i32
      %c127_i32_54 = arith.constant 127 : i32
      %98 = arith.maxsi %c0_i32_53, %97 : i32
      %99 = arith.minsi %c127_i32_54, %98 : i32
      %c5_i32 = arith.constant 5 : i32
      %c5_i32_55 = arith.constant 5 : i32
      %c0_i32_56 = arith.constant 0 : i32
      %100 = tpu.memref_slice %arg2[%99, %c0_i32_56] : memref<128x128xf32, #tpu.memory_space<any>> -> memref<1x128xf32, #tpu.memory_space<any>>
      %101 = tpu.memref_squeeze %100 : memref<1x128xf32, #tpu.memory_space<any>> -> memref<128xf32, #tpu.memory_space<any>>
      %c0_i32_57 = arith.constant 0 : i32
      %102 = tpu.memref_slice %arg12[%c5_i32, %c0_i32_57] : memref<8x128xf32, #tpu.memory_space<vmem>> -> memref<1x128xf32, #tpu.memory_space<vmem>>
      %103 = tpu.memref_squeeze %102 : memref<1x128xf32, #tpu.memory_space<vmem>> -> memref<128xf32, #tpu.memory_space<vmem>>
      %104 = tpu.memref_slice %arg13[%c5_i32_55] : memref<8x!tpu.dma_semaphore, #tpu.memory_space<semaphore_mem>> -> memref<1x!tpu.dma_semaphore, #tpu.memory_space<semaphore_mem>>
      %105 = tpu.memref_squeeze %104 : memref<1x!tpu.dma_semaphore, #tpu.memory_space<semaphore_mem>> -> memref<!tpu.dma_semaphore, #tpu.memory_space<semaphore_mem>>
      tpu.enqueue_dma source(%101 : memref<128xf32, #tpu.memory_space<any>>) target(%103 : memref<128xf32, #tpu.memory_space<vmem>>) target_semaphore(%105 : memref<!tpu.dma_semaphore, #tpu.memory_space<semaphore_mem>>)
      %c6 = arith.constant 6 : index
      %106 = memref.load %arg1[%c6] : memref<8xi32, #tpu.memory_space<smem>>
      %c0_i32_58 = arith.constant 0 : i32
      %c127_i32_59 = arith.constant 127 : i32
      %107 = arith.maxsi %c0_i32_58, %106 : i32
      %108 = arith.minsi %c127_i32_59, %107 : i32
      %c6_i32 = arith.constant 6 : i32
      %c6_i32_60 = arith.constant 6 : i32
      %c0_i32_61 = arith.constant 0 : i32
      %109 = tpu.memref_slice %arg2[%108, %c0_i32_61] : memref<128x128xf32, #tpu.memory_space<any>> -> memref<1x128xf32, #tpu.memory_space<any>>
      %110 = tpu.memref_squeeze %109 : memref<1x128xf32, #tpu.memory_space<any>> -> memref<128xf32, #tpu.memory_space<any>>
      %c0_i32_62 = arith.constant 0 : i32
      %111 = tpu.memref_slice %arg12[%c6_i32, %c0_i32_62] : memref<8x128xf32, #tpu.memory_space<vmem>> -> memref<1x128xf32, #tpu.memory_space<vmem>>
      %112 = tpu.memref_squeeze %111 : memref<1x128xf32, #tpu.memory_space<vmem>> -> memref<128xf32, #tpu.memory_space<vmem>>
      %113 = tpu.memref_slice %arg13[%c6_i32_60] : memref<8x!tpu.dma_semaphore, #tpu.memory_space<semaphore_mem>> -> memref<1x!tpu.dma_semaphore, #tpu.memory_space<semaphore_mem>>
      %114 = tpu.memref_squeeze %113 : memref<1x!tpu.dma_semaphore, #tpu.memory_space<semaphore_mem>> -> memref<!tpu.dma_semaphore, #tpu.memory_space<semaphore_mem>>
      tpu.enqueue_dma source(%110 : memref<128xf32, #tpu.memory_space<any>>) target(%112 : memref<128xf32, #tpu.memory_space<vmem>>) target_semaphore(%114 : memref<!tpu.dma_semaphore, #tpu.memory_space<semaphore_mem>>)
      %c7 = arith.constant 7 : index
      %115 = memref.load %arg1[%c7] : memref<8xi32, #tpu.memory_space<smem>>
      %c0_i32_63 = arith.constant 0 : i32
      %c127_i32_64 = arith.constant 127 : i32
      %116 = arith.maxsi %c0_i32_63, %115 : i32
      %117 = arith.minsi %c127_i32_64, %116 : i32
      %c7_i32 = arith.constant 7 : i32
      %c7_i32_65 = arith.constant 7 : i32
      %c0_i32_66 = arith.constant 0 : i32
      %118 = tpu.memref_slice %arg2[%117, %c0_i32_66] : memref<128x128xf32, #tpu.memory_space<any>> -> memref<1x128xf32, #tpu.memory_space<any>>
      %119 = tpu.memref_squeeze %118 : memref<1x128xf32, #tpu.memory_space<any>> -> memref<128xf32, #tpu.memory_space<any>>
      %c0_i32_67 = arith.constant 0 : i32
      %120 = tpu.memref_slice %arg12[%c7_i32, %c0_i32_67] : memref<8x128xf32, #tpu.memory_space<vmem>> -> memref<1x128xf32, #tpu.memory_space<vmem>>
      %121 = tpu.memref_squeeze %120 : memref<1x128xf32, #tpu.memory_space<vmem>> -> memref<128xf32, #tpu.memory_space<vmem>>
      %122 = tpu.memref_slice %arg13[%c7_i32_65] : memref<8x!tpu.dma_semaphore, #tpu.memory_space<semaphore_mem>> -> memref<1x!tpu.dma_semaphore, #tpu.memory_space<semaphore_mem>>
      %123 = tpu.memref_squeeze %122 : memref<1x!tpu.dma_semaphore, #tpu.memory_space<semaphore_mem>> -> memref<!tpu.dma_semaphore, #tpu.memory_space<semaphore_mem>>
      tpu.enqueue_dma source(%119 : memref<128xf32, #tpu.memory_space<any>>) target(%121 : memref<128xf32, #tpu.memory_space<vmem>>) target_semaphore(%123 : memref<!tpu.dma_semaphore, #tpu.memory_space<semaphore_mem>>)
      %c0_i32_68 = arith.constant 0 : i32
      %c0_i32_69 = arith.constant 0 : i32
      %c0_i32_70 = arith.constant 0 : i32
      %c0_i32_71 = arith.constant 0 : i32
      %124 = tpu.memref_slice %arg2[%c0_i32_68, %c0_i32_71] : memref<128x128xf32, #tpu.memory_space<any>> -> memref<1x128xf32, #tpu.memory_space<any>>
      %125 = tpu.memref_squeeze %124 : memref<1x128xf32, #tpu.memory_space<any>> -> memref<128xf32, #tpu.memory_space<any>>
      %c0_i32_72 = arith.constant 0 : i32
      %126 = tpu.memref_slice %arg12[%c0_i32_69, %c0_i32_72] : memref<8x128xf32, #tpu.memory_space<vmem>> -> memref<1x128xf32, #tpu.memory_space<vmem>>
      %127 = tpu.memref_squeeze %126 : memref<1x128xf32, #tpu.memory_space<vmem>> -> memref<128xf32, #tpu.memory_space<vmem>>
      %128 = tpu.memref_slice %arg13[%c0_i32_70] : memref<8x!tpu.dma_semaphore, #tpu.memory_space<semaphore_mem>> -> memref<1x!tpu.dma_semaphore, #tpu.memory_space<semaphore_mem>>
      %129 = tpu.memref_squeeze %128 : memref<1x!tpu.dma_semaphore, #tpu.memory_space<semaphore_mem>> -> memref<!tpu.dma_semaphore, #tpu.memory_space<semaphore_mem>>
      tpu.wait_dma2 semaphore(%129 : memref<!tpu.dma_semaphore, #tpu.memory_space<semaphore_mem>>) src(%125 : memref<128xf32, #tpu.memory_space<any>>) dst(%127 : memref<128xf32, #tpu.memory_space<vmem>>)
      %c0_i32_73 = arith.constant 0 : i32
      %c1_i32_74 = arith.constant 1 : i32
      %c1_i32_75 = arith.constant 1 : i32
      %c0_i32_76 = arith.constant 0 : i32
      %130 = tpu.memref_slice %arg2[%c0_i32_73, %c0_i32_76] : memref<128x128xf32, #tpu.memory_space<any>> -> memref<1x128xf32, #tpu.memory_space<any>>
      %131 = tpu.memref_squeeze %130 : memref<1x128xf32, #tpu.memory_space<any>> -> memref<128xf32, #tpu.memory_space<any>>
      %c0_i32_77 = arith.constant 0 : i32
      %132 = tpu.memref_slice %arg12[%c1_i32_74, %c0_i32_77] : memref<8x128xf32, #tpu.memory_space<vmem>> -> memref<1x128xf32, #tpu.memory_space<vmem>>
      %133 = tpu.memref_squeeze %132 : memref<1x128xf32, #tpu.memory_space<vmem>> -> memref<128xf32, #tpu.memory_space<vmem>>
      %134 = tpu.memref_slice %arg13[%c1_i32_75] : memref<8x!tpu.dma_semaphore, #tpu.memory_space<semaphore_mem>> -> memref<1x!tpu.dma_semaphore, #tpu.memory_space<semaphore_mem>>
      %135 = tpu.memref_squeeze %134 : memref<1x!tpu.dma_semaphore, #tpu.memory_space<semaphore_mem>> -> memref<!tpu.dma_semaphore, #tpu.memory_space<semaphore_mem>>
      tpu.wait_dma2 semaphore(%135 : memref<!tpu.dma_semaphore, #tpu.memory_space<semaphore_mem>>) src(%131 : memref<128xf32, #tpu.memory_space<any>>) dst(%133 : memref<128xf32, #tpu.memory_space<vmem>>)
      %c0_i32_78 = arith.constant 0 : i32
      %c2_i32_79 = arith.constant 2 : i32
      %c2_i32_80 = arith.constant 2 : i32
      %c0_i32_81 = arith.constant 0 : i32
      %136 = tpu.memref_slice %arg2[%c0_i32_78, %c0_i32_81] : memref<128x128xf32, #tpu.memory_space<any>> -> memref<1x128xf32, #tpu.memory_space<any>>
      %137 = tpu.memref_squeeze %136 : memref<1x128xf32, #tpu.memory_space<any>> -> memref<128xf32, #tpu.memory_space<any>>
      %c0_i32_82 = arith.constant 0 : i32
      %138 = tpu.memref_slice %arg12[%c2_i32_79, %c0_i32_82] : memref<8x128xf32, #tpu.memory_space<vmem>> -> memref<1x128xf32, #tpu.memory_space<vmem>>
      %139 = tpu.memref_squeeze %138 : memref<1x128xf32, #tpu.memory_space<vmem>> -> memref<128xf32, #tpu.memory_space<vmem>>
      %140 = tpu.memref_slice %arg13[%c2_i32_80] : memref<8x!tpu.dma_semaphore, #tpu.memory_space<semaphore_mem>> -> memref<1x!tpu.dma_semaphore, #tpu.memory_space<semaphore_mem>>
      %141 = tpu.memref_squeeze %140 : memref<1x!tpu.dma_semaphore, #tpu.memory_space<semaphore_mem>> -> memref<!tpu.dma_semaphore, #tpu.memory_space<semaphore_mem>>
      tpu.wait_dma2 semaphore(%141 : memref<!tpu.dma_semaphore, #tpu.memory_space<semaphore_mem>>) src(%137 : memref<128xf32, #tpu.memory_space<any>>) dst(%139 : memref<128xf32, #tpu.memory_space<vmem>>)
      %c0_i32_83 = arith.constant 0 : i32
      %c3_i32_84 = arith.constant 3 : i32
      %c3_i32_85 = arith.constant 3 : i32
      %c0_i32_86 = arith.constant 0 : i32
      %142 = tpu.memref_slice %arg2[%c0_i32_83, %c0_i32_86] : memref<128x128xf32, #tpu.memory_space<any>> -> memref<1x128xf32, #tpu.memory_space<any>>
      %143 = tpu.memref_squeeze %142 : memref<1x128xf32, #tpu.memory_space<any>> -> memref<128xf32, #tpu.memory_space<any>>
      %c0_i32_87 = arith.constant 0 : i32
      %144 = tpu.memref_slice %arg12[%c3_i32_84, %c0_i32_87] : memref<8x128xf32, #tpu.memory_space<vmem>> -> memref<1x128xf32, #tpu.memory_space<vmem>>
      %145 = tpu.memref_squeeze %144 : memref<1x128xf32, #tpu.memory_space<vmem>> -> memref<128xf32, #tpu.memory_space<vmem>>
      %146 = tpu.memref_slice %arg13[%c3_i32_85] : memref<8x!tpu.dma_semaphore, #tpu.memory_space<semaphore_mem>> -> memref<1x!tpu.dma_semaphore, #tpu.memory_space<semaphore_mem>>
      %147 = tpu.memref_squeeze %146 : memref<1x!tpu.dma_semaphore, #tpu.memory_space<semaphore_mem>> -> memref<!tpu.dma_semaphore, #tpu.memory_space<semaphore_mem>>
      tpu.wait_dma2 semaphore(%147 : memref<!tpu.dma_semaphore, #tpu.memory_space<semaphore_mem>>) src(%143 : memref<128xf32, #tpu.memory_space<any>>) dst(%145 : memref<128xf32, #tpu.memory_space<vmem>>)
      %c0_i32_88 = arith.constant 0 : i32
      %c4_i32_89 = arith.constant 4 : i32
      %c4_i32_90 = arith.constant 4 : i32
      %c0_i32_91 = arith.constant 0 : i32
      %148 = tpu.memref_slice %arg2[%c0_i32_88, %c0_i32_91] : memref<128x128xf32, #tpu.memory_space<any>> -> memref<1x128xf32, #tpu.memory_space<any>>
      %149 = tpu.memref_squeeze %148 : memref<1x128xf32, #tpu.memory_space<any>> -> memref<128xf32, #tpu.memory_space<any>>
      %c0_i32_92 = arith.constant 0 : i32
      %150 = tpu.memref_slice %arg12[%c4_i32_89, %c0_i32_92] : memref<8x128xf32, #tpu.memory_space<vmem>> -> memref<1x128xf32, #tpu.memory_space<vmem>>
      %151 = tpu.memref_squeeze %150 : memref<1x128xf32, #tpu.memory_space<vmem>> -> memref<128xf32, #tpu.memory_space<vmem>>
      %152 = tpu.memref_slice %arg13[%c4_i32_90] : memref<8x!tpu.dma_semaphore, #tpu.memory_space<semaphore_mem>> -> memref<1x!tpu.dma_semaphore, #tpu.memory_space<semaphore_mem>>
      %153 = tpu.memref_squeeze %152 : memref<1x!tpu.dma_semaphore, #tpu.memory_space<semaphore_mem>> -> memref<!tpu.dma_semaphore, #tpu.memory_space<semaphore_mem>>
      tpu.wait_dma2 semaphore(%153 : memref<!tpu.dma_semaphore, #tpu.memory_space<semaphore_mem>>) src(%149 : memref<128xf32, #tpu.memory_space<any>>) dst(%151 : memref<128xf32, #tpu.memory_space<vmem>>)
      %c0_i32_93 = arith.constant 0 : i32
      %c5_i32_94 = arith.constant 5 : i32
      %c5_i32_95 = arith.constant 5 : i32
      %c0_i32_96 = arith.constant 0 : i32
      %154 = tpu.memref_slice %arg2[%c0_i32_93, %c0_i32_96] : memref<128x128xf32, #tpu.memory_space<any>> -> memref<1x128xf32, #tpu.memory_space<any>>
      %155 = tpu.memref_squeeze %154 : memref<1x128xf32, #tpu.memory_space<any>> -> memref<128xf32, #tpu.memory_space<any>>
      %c0_i32_97 = arith.constant 0 : i32
      %156 = tpu.memref_slice %arg12[%c5_i32_94, %c0_i32_97] : memref<8x128xf32, #tpu.memory_space<vmem>> -> memref<1x128xf32, #tpu.memory_space<vmem>>
      %157 = tpu.memref_squeeze %156 : memref<1x128xf32, #tpu.memory_space<vmem>> -> memref<128xf32, #tpu.memory_space<vmem>>
      %158 = tpu.memref_slice %arg13[%c5_i32_95] : memref<8x!tpu.dma_semaphore, #tpu.memory_space<semaphore_mem>> -> memref<1x!tpu.dma_semaphore, #tpu.memory_space<semaphore_mem>>
      %159 = tpu.memref_squeeze %158 : memref<1x!tpu.dma_semaphore, #tpu.memory_space<semaphore_mem>> -> memref<!tpu.dma_semaphore, #tpu.memory_space<semaphore_mem>>
      tpu.wait_dma2 semaphore(%159 : memref<!tpu.dma_semaphore, #tpu.memory_space<semaphore_mem>>) src(%155 : memref<128xf32, #tpu.memory_space<any>>) dst(%157 : memref<128xf32, #tpu.memory_space<vmem>>)
      %c0_i32_98 = arith.constant 0 : i32
      %c6_i32_99 = arith.constant 6 : i32
      %c6_i32_100 = arith.constant 6 : i32
      %c0_i32_101 = arith.constant 0 : i32
      %160 = tpu.memref_slice %arg2[%c0_i32_98, %c0_i32_101] : memref<128x128xf32, #tpu.memory_space<any>> -> memref<1x128xf32, #tpu.memory_space<any>>
      %161 = tpu.memref_squeeze %160 : memref<1x128xf32, #tpu.memory_space<any>> -> memref<128xf32, #tpu.memory_space<any>>
      %c0_i32_102 = arith.constant 0 : i32
      %162 = tpu.memref_slice %arg12[%c6_i32_99, %c0_i32_102] : memref<8x128xf32, #tpu.memory_space<vmem>> -> memref<1x128xf32, #tpu.memory_space<vmem>>
      %163 = tpu.memref_squeeze %162 : memref<1x128xf32, #tpu.memory_space<vmem>> -> memref<128xf32, #tpu.memory_space<vmem>>
      %164 = tpu.memref_slice %arg13[%c6_i32_100] : memref<8x!tpu.dma_semaphore, #tpu.memory_space<semaphore_mem>> -> memref<1x!tpu.dma_semaphore, #tpu.memory_space<semaphore_mem>>
      %165 = tpu.memref_squeeze %164 : memref<1x!tpu.dma_semaphore, #tpu.memory_space<semaphore_mem>> -> memref<!tpu.dma_semaphore, #tpu.memory_space<semaphore_mem>>
      tpu.wait_dma2 semaphore(%165 : memref<!tpu.dma_semaphore, #tpu.memory_space<semaphore_mem>>) src(%161 : memref<128xf32, #tpu.memory_space<any>>) dst(%163 : memref<128xf32, #tpu.memory_space<vmem>>)
      %c0_i32_103 = arith.constant 0 : i32
      %c7_i32_104 = arith.constant 7 : i32
      %c7_i32_105 = arith.constant 7 : i32
      %c0_i32_106 = arith.constant 0 : i32
      %166 = tpu.memref_slice %arg2[%c0_i32_103, %c0_i32_106] : memref<128x128xf32, #tpu.memory_space<any>> -> memref<1x128xf32, #tpu.memory_space<any>>
      %167 = tpu.memref_squeeze %166 : memref<1x128xf32, #tpu.memory_space<any>> -> memref<128xf32, #tpu.memory_space<any>>
      %c0_i32_107 = arith.constant 0 : i32
      %168 = tpu.memref_slice %arg12[%c7_i32_104, %c0_i32_107] : memref<8x128xf32, #tpu.memory_space<vmem>> -> memref<1x128xf32, #tpu.memory_space<vmem>>
      %169 = tpu.memref_squeeze %168 : memref<1x128xf32, #tpu.memory_space<vmem>> -> memref<128xf32, #tpu.memory_space<vmem>>
      %170 = tpu.memref_slice %arg13[%c7_i32_105] : memref<8x!tpu.dma_semaphore, #tpu.memory_space<semaphore_mem>> -> memref<1x!tpu.dma_semaphore, #tpu.memory_space<semaphore_mem>>
      %171 = tpu.memref_squeeze %170 : memref<1x!tpu.dma_semaphore, #tpu.memory_space<semaphore_mem>> -> memref<!tpu.dma_semaphore, #tpu.memory_space<semaphore_mem>>
      tpu.wait_dma2 semaphore(%171 : memref<!tpu.dma_semaphore, #tpu.memory_space<semaphore_mem>>) src(%167 : memref<128xf32, #tpu.memory_space<any>>) dst(%169 : memref<128xf32, #tpu.memory_space<vmem>>)
    } else {
    }
    %c0 = arith.constant 0 : index
    %c0_1 = arith.constant 0 : index
    %3 = vector.load %arg12[%c0, %c0_1] : memref<8x128xf32, #tpu.memory_space<vmem>>, vector<8x128xf32>
    %c0_2 = arith.constant 0 : index
    %c0_3 = arith.constant 0 : index
    %c0_4 = arith.constant 0 : index
    %4 = vector.load %arg5[%c0_2, %c0_3, %c0_4] : memref<1x8x128xf32, #tpu.memory_space<vmem>>, vector<1x8x128xf32>
    %5 = vector.shape_cast %4 : vector<1x8x128xf32> to vector<8x128xf32>
    %c0_5 = arith.constant 0 : index
    %c0_6 = arith.constant 0 : index
    %c0_7 = arith.constant 0 : index
    %6 = vector.load %arg6[%c0_5, %c0_6, %c0_7] : memref<1x8x128xf32, #tpu.memory_space<vmem>>, vector<1x8x128xf32>
    %7 = vector.shape_cast %6 : vector<1x8x128xf32> to vector<8x128xf32>
    %8 = tpu.concatenate %3, %5 in 1 : vector<8x128xf32>, vector<8x128xf32> -> vector<8x256xf32>
    %9 = arith.truncf %8 : vector<8x256xf32> to vector<8x256xbf16>
    %c0_8 = arith.constant 0 : index
    %c0_9 = arith.constant 0 : index
    %c0_10 = arith.constant 0 : index
    %10 = vector.load %arg3[%c0_8, %c0_9, %c0_10] : memref<1x256x512xbf16, #tpu.memory_space<vmem>>, vector<1x256x512xbf16>
    %11 = vector.shape_cast %10 : vector<1x256x512xbf16> to vector<256x512xbf16>
    %cst = arith.constant dense<0.000000e+00> : vector<8x512xf32>
    %12 = tpu.matmul %9, %11, %cst {dimension_numbers = #tpu.dot_dimension_numbers<[1], [0], [0], [1], [0, 0, 1, 1], [], []>} : vector<8x256xbf16>, vector<256x512xbf16>, vector<8x512xf32> -> vector<8x512xf32>
    %c0_11 = arith.constant 0 : index
    %c0_12 = arith.constant 0 : index
    %c0_13 = arith.constant 0 : index
    %13 = vector.load %arg4[%c0_11, %c0_12, %c0_13] : memref<1x1x512xf32, #tpu.memory_space<vmem>>, vector<1x1x512xf32>
    %14 = vector.shape_cast %13 : vector<1x1x512xf32> to vector<1x512xf32>
    %15 = vector.broadcast %14 : vector<1x512xf32> to vector<8x512xf32>
    %16 = arith.addf %12, %15 : vector<8x512xf32>
    %17 = vector.extract_strided_slice %16 {offsets = [0, 0], sizes = [8, 128], strides = [1, 1]} : vector<8x512xf32> to vector<8x128xf32>
    %18 = arith.negf %17 : vector<8x128xf32>
    %19 = math.exp %18 : vector<8x128xf32>
    %cst_14 = arith.constant 1.000000e+00 : f32
    %20 = vector.broadcast %cst_14 : f32 to vector<8x128xf32>
    %21 = arith.addf %20, %19 : vector<8x128xf32>
    %22 = arith.divf %20, %21 : vector<8x128xf32>
    %23 = vector.extract_strided_slice %16 {offsets = [0, 128], sizes = [8, 128], strides = [1, 1]} : vector<8x512xf32> to vector<8x128xf32>
    %24 = arith.negf %23 : vector<8x128xf32>
    %25 = math.exp %24 : vector<8x128xf32>
    %cst_15 = arith.constant 1.000000e+00 : f32
    %26 = vector.broadcast %cst_15 : f32 to vector<8x128xf32>
    %27 = arith.addf %26, %25 : vector<8x128xf32>
    %28 = arith.divf %26, %27 : vector<8x128xf32>
    %29 = vector.extract_strided_slice %16 {offsets = [0, 256], sizes = [8, 128], strides = [1, 1]} : vector<8x512xf32> to vector<8x128xf32>
    %30 = math.tanh %29 : vector<8x128xf32>
    %31 = vector.extract_strided_slice %16 {offsets = [0, 384], sizes = [8, 128], strides = [1, 1]} : vector<8x512xf32> to vector<8x128xf32>
    %32 = arith.negf %31 : vector<8x128xf32>
    %33 = math.exp %32 : vector<8x128xf32>
    %cst_16 = arith.constant 1.000000e+00 : f32
    %34 = vector.broadcast %cst_16 : f32 to vector<8x128xf32>
    %35 = arith.addf %34, %33 : vector<8x128xf32>
    %36 = arith.divf %34, %35 : vector<8x128xf32>
    %37 = arith.mulf %28, %7 : vector<8x128xf32>
    %38 = arith.mulf %22, %30 : vector<8x128xf32>
    %39 = arith.addf %37, %38 : vector<8x128xf32>
    %40 = math.tanh %39 : vector<8x128xf32>
    %41 = arith.mulf %36, %40 : vector<8x128xf32>
    %c0_17 = arith.constant 0 : index
    %c0_18 = arith.constant 0 : index
    %c0_19 = arith.constant 0 : index
    %42 = vector.load %arg10[%c0_17, %c0_18, %c0_19] : memref<1x8x128xf32, #tpu.memory_space<vmem>>, vector<1x8x128xf32>
    %43 = vector.shape_cast %42 : vector<1x8x128xf32> to vector<8x128xf32>
    %44 = vector.shape_cast %41 : vector<8x128xf32> to vector<1x8x128xf32>
    tpu.vector_store %arg10[%c0_17, %c0_18, %c0_19], %44 {strides = array<i32>} : memref<1x8x128xf32, #tpu.memory_space<vmem>>, vector<1x8x128xf32>,
    %c0_20 = arith.constant 0 : index
    %c0_21 = arith.constant 0 : index
    %c0_22 = arith.constant 0 : index
    %45 = vector.load %arg11[%c0_20, %c0_21, %c0_22] : memref<1x8x128xf32, #tpu.memory_space<vmem>>, vector<1x8x128xf32>
    %46 = vector.shape_cast %45 : vector<1x8x128xf32> to vector<8x128xf32>
    %47 = vector.shape_cast %39 : vector<8x128xf32> to vector<1x8x128xf32>
    tpu.vector_store %arg11[%c0_20, %c0_21, %c0_22], %47 {strides = array<i32>} : memref<1x8x128xf32, #tpu.memory_space<vmem>>, vector<1x8x128xf32>,
    %c0_23 = arith.constant 0 : index
    %c0_24 = arith.constant 0 : index
    %48 = vector.load %arg12[%c0_23, %c0_24] : memref<8x128xf32, #tpu.memory_space<vmem>>, vector<8x128xf32>
    tpu.vector_store %arg12[%c0_23, %c0_24], %41 {strides = array<i32>} : memref<8x128xf32, #tpu.memory_space<vmem>>, vector<8x128xf32>,
    %c1_i32 = arith.constant 1 : i32
    %49 = arith.cmpi eq, %arg0, %c1_i32 : i32
    %50 = arith.extui %49 : i1 to i32
    %c0_i32_25 = arith.constant 0 : i32
    %51 = arith.cmpi ne, %50, %c0_i32_25 : i32
    scf.if %51 {
      %52 = arith.truncf %41 : vector<8x128xf32> to vector<8x128xbf16>
      %c0_26 = arith.constant 0 : index
      %c0_27 = arith.constant 0 : index
      %53 = vector.load %arg7[%c0_26, %c0_27] : memref<128x128xbf16, #tpu.memory_space<vmem>>, vector<128x128xbf16>
      %cst_28 = arith.constant dense<0.000000e+00> : vector<8x128xf32>
      %54 = tpu.matmul %52, %53, %cst_28 {dimension_numbers = #tpu.dot_dimension_numbers<[1], [0], [0], [1], [0, 0, 1, 1], [], []>} : vector<8x128xbf16>, vector<128x128xbf16>, vector<8x128xf32> -> vector<8x128xf32>
      %c0_29 = arith.constant 0 : index
      %c0_30 = arith.constant 0 : index
      %55 = vector.load %arg8[%c0_29, %c0_30] : memref<1x128xf32, #tpu.memory_space<vmem>>, vector<1x128xf32>
      %56 = vector.broadcast %55 : vector<1x128xf32> to vector<8x128xf32>
      %57 = arith.addf %54, %56 : vector<8x128xf32>
      %c0_31 = arith.constant 0 : index
      %c0_32 = arith.constant 0 : index
      %58 = vector.load %arg9[%c0_31, %c0_32] : memref<8x128xf32, #tpu.memory_space<vmem>>, vector<8x128xf32>
      tpu.vector_store %arg9[%c0_31, %c0_32], %57 {strides = array<i32>} : memref<8x128xf32, #tpu.memory_space<vmem>>, vector<8x128xf32>,
    } else {
    }
    return
  }
  func.func @transform_1(%arg0: i32, %arg1: memref<8xi32, #tpu.memory_space<smem>>) -> (i32, i32, i32) {
    %c0_i32 = arith.constant 0 : i32
    %c0_i32_0 = arith.constant 0 : i32
    %c0_i32_1 = arith.constant 0 : i32
    return %arg0, %c0_i32, %c0_i32_0 : i32, i32, i32
  }
  func.func @transform_2(%arg0: i32, %arg1: memref<8xi32, #tpu.memory_space<smem>>) -> (i32, i32, i32) {
    %c0_i32 = arith.constant 0 : i32
    %c0_i32_0 = arith.constant 0 : i32
    %c0_i32_1 = arith.constant 0 : i32
    return %arg0, %c0_i32, %c0_i32_0 : i32, i32, i32
  }
  func.func @transform_3(%arg0: i32, %arg1: memref<8xi32, #tpu.memory_space<smem>>) -> (i32, i32, i32) {
    %c0_i32 = arith.constant 0 : i32
    %c0_i32_0 = arith.constant 0 : i32
    %c0_i32_1 = arith.constant 0 : i32
    return %arg0, %c0_i32, %c0_i32_0 : i32, i32, i32
  }
  func.func @transform_4(%arg0: i32, %arg1: memref<8xi32, #tpu.memory_space<smem>>) -> (i32, i32, i32) {
    %c0_i32 = arith.constant 0 : i32
    %c0_i32_0 = arith.constant 0 : i32
    %c0_i32_1 = arith.constant 0 : i32
    return %arg0, %c0_i32, %c0_i32_0 : i32, i32, i32
  }
  func.func @transform_5(%arg0: i32, %arg1: memref<8xi32, #tpu.memory_space<smem>>) -> (i32, i32) {
    %c0_i32 = arith.constant 0 : i32
    %c0_i32_0 = arith.constant 0 : i32
    %c0_i32_1 = arith.constant 0 : i32
    return %c0_i32, %c0_i32_0 : i32, i32
  }
  func.func @transform_6(%arg0: i32, %arg1: memref<8xi32, #tpu.memory_space<smem>>) -> (i32, i32) {
    %c0_i32 = arith.constant 0 : i32
    %c0_i32_0 = arith.constant 0 : i32
    %c0_i32_1 = arith.constant 0 : i32
    return %c0_i32, %c0_i32_0 : i32, i32
  }
  func.func @transform_7(%arg0: i32, %arg1: memref<8xi32, #tpu.memory_space<smem>>) -> (i32, i32) {
    %c0_i32 = arith.constant 0 : i32
    %c0_i32_0 = arith.constant 0 : i32
    %c0_i32_1 = arith.constant 0 : i32
    return %c0_i32, %c0_i32_0 : i32, i32
  }
  func.func @transform_8(%arg0: i32, %arg1: memref<8xi32, #tpu.memory_space<smem>>) -> (i32, i32, i32) {
    %c0_i32 = arith.constant 0 : i32
    %c0_i32_0 = arith.constant 0 : i32
    %c0_i32_1 = arith.constant 0 : i32
    return %arg0, %c0_i32, %c0_i32_0 : i32, i32, i32
  }
  func.func @transform_9(%arg0: i32, %arg1: memref<8xi32, #tpu.memory_space<smem>>) -> (i32, i32, i32) {
    %c0_i32 = arith.constant 0 : i32
    %c0_i32_0 = arith.constant 0 : i32
    %c0_i32_1 = arith.constant 0 : i32
    return %arg0, %c0_i32, %c0_i32_0 : i32, i32, i32
  }
}

</mosaic_0001>

<bundles_post_ra>
// kernel: tpu_custom_call.1
= control target key start
LH: loop header
LB: loop body
LE: loop exit
PB: predicated region body
PF: predicated region fallthrough
CT: control target
= control target key end

     0   :  { %s3263_s0 = inlined_call_operand.hbm [shape: s32[8], index: 0, kind: input, shape index: {}]   ;;  %s3264_s1 = inlined_call_operand.hbm [shape: f32[128,128], index: 1, kind: input, shape index: {}]   ;;  %s3265_s2 = inlined_call_operand.hbm [shape: bf16[2,256,512], index: 2, kind: input, shape index: {}]   ;;  %s3266_s3 = inlined_call_operand.hbm [shape: f32[2,1,512], index: 3, kind: input, shape index: {}]   ;;  %s3267_s4 = inlined_call_operand.hbm [shape: f32[2,8,128], index: 4, kind: input, shape index: {}]   ;;  %s3268_s5 = inlined_call_operand.vmem [shape: f32[2,8,128], index: 5, kind: input, shape index: {}]   ;;  %s3269_s6 = inlined_call_operand.hbm [shape: bf16[128,128], index: 6, kind: input, shape index: {}]   ;;  %s3270_s7 = inlined_call_operand.vmem [shape: f32[1,128], index: 7, kind: input, shape index: {}]   ;;  %s3271_s8 = inlined_call_operand.hbm [shape: f32[8,128], index: 8, kind: output, shape index: {0}]   ;;  %s3272_s9 = inlined_call_operand.hbm [shape: f32[2,8,128], index: 9, kind: output, shape index: {1}]   ;;  %s3273_s10 = inlined_call_operand.hbm [shape: f32[2,8,128], index: 10, kind: output, shape index: {2}]  }
   0x1   :  { %3293 = sst [smem:[#allocation54_spill]] %s3265_s2  ;;  %s1995_s15 = scalar_lea.hbm %s3263_s0, 16 }
   0x2   :  { %3294 = sst [smem:[#allocation55_spill]] %s3266_s3  ;;  %p1996_p0 = scmp.ne.s32.totalorder %s3263_s0, %s1995_s15 }
   0x3   :  { %3295 = sst [smem:[#allocation56_spill]] %s3267_s4  ;;  %p1999_p1 = scmp.lt.u32.totalorder %s1995_s15, %s3263_s0 }
   0x4   :  { %3296 = sst [smem:[#allocation57_spill]] %s3271_s8 }
   0x5   :  { %3297 = sst [smem:[#allocation58_spill]] %s3272_s9  ;;  %p2001_p2 = pnand %p1999_p1, %p1996_p0 }
   0x6   :  { %3298 = sst [smem:[#allocation59_spill]] %s3273_s10 }
   0x7   :  { %2004 = shalt.err (!%p2001_p2)  }
   0x8   :  { %s2515_s20 = smov [#allocation5]  }
   0x9   :  { %17 = dma.hbm_to_smem %s3263_s0, 16, %s2515_s20, [#allocation4] }
   0xa   :  { %2445 = dma.done.wait [#allocation4], 16 }
   0xb   :  { %2446 = vsyncadd [#allocation4], 4294967280 }
   0xc   :  { %19 = sfence }
   0xd   :  { %20 = vsyncpa [#allocation7], 0 }
   0xe   :  { %22 = vsyncpa [#allocation7 + $0x1], 0 }
   0xf   :  { %23 = vsyncpa [#allocation10], 0 }
  0x10   :  { %25 = vsyncpa [#allocation10 + $0x1], 0 }
  0x11   :  { %26 = vsyncpa [#allocation13], 0 }
  0x12   :  { %27 = vsyncpa [#allocation8], 0 }
  0x13   :  { %28 = vsyncpa [#allocation16], 0 }
  0x14   :  { %30 = vsyncpa [#allocation16 + $0x1], 0  ;;  %s2604_s23 = smov 0   ;;  %s2606_s24 = smov 0  }
  0x15   :  { %s2608_s25 = smov 0   ;;  %s2610_s26 = smov 0  }
  0x16 LB: > { %3299 = sst [smem:[#allocation50_spill]] %s2509_s25  ;;  %s2625_s0 = sadd.s32 1, %s2513_s26   ;;  %s2513_s26 = sphi %s2610_s26, %s3381_s26   ;;  %s2509_s25 = sphi %s2608_s25, %s3383_s25   ;;  %s2505_s24 = sphi %s2606_s24, %s3385_s24   ;;  %s2501_s23 = sphi %s2604_s23, %s3384_s23  }
  0x17   : > { %3300 = sst [smem:[#allocation51_spill]] %s2625_s0  ;;  %s43_s27 = sadd.s32 1, %s2509_s25 }
  0x18   : > { %s40_s28 = ssub.s32 %s2513_s26, %s2625_s0  ;;  %p3274_p3 = scmp.ne.s32.totalorder %s2509_s25, %s2505_s24 }
  0x19   : > { %p41_p4 = scmp.eq.s32.totalorder %s40_s28, 0  ;;  %p51_p5 = scmp.eq.s32.totalorder %s2513_s26, 0 }
  0x1a   : > { %p1820_p7 = scmp.lt.s32.totalorder %s2513_s26, 2  ;;  %s2642_s30 = sand.u32 1, %s2509_s25  }
  0x1b   : > { %s2636_s29 = scalar_select %p41_p4, %s2509_s25, %s43_s27  }
  0x1c   : > { %p52_p8 = por %p51_p5, %p3274_p3  ;;  %s310_s11 = sand.u32 1, %s2513_s26  }
  0x1d   : > { %3301 = sst [smem:[#allocation52_spill]] %s2636_s29  ;;  %s1554_s12 = sshll.u32 %s2642_s30, 2 }
  0x1e   : > { %p2646_p9 = pnand %p1820_p7, %p52_p8  ;;  %s1717_s14 = sshll.u32 %s2513_s26, 6 }
  0x1f   : > { %s3303_s3 = sld [smem:[#allocation55_spill]]  ;;  %s314_s18 = scalar_lea.vmem [#allocation9], %s1554_s12 }
  0x20   : > { %s3302_s13 = scalar_select %p2646_p9, 1, 0 }
  0x21   : > { %s322_s19 = sshll.u32 %s314_s18, 4  ;;  %s2658_s20 = scalar_lea.sflag [#allocation10], %s310_s11  ;;  %s2656_s19 = int_to_ptr.vmem [resolvable:$true] %s322_s19 }
  0x22   : > { %p2664_p11 = pneg %p2646_p9 }
  0x24   : > { %s3304_s22 = scalar_select %p2664_p11, 1, 0 }
  0x25   : > { %s2654_s17 = scalar_lea.hbm %s3303_s3, %s1717_s14  ;;  %s2010_s12 = scalar_lea.hbm %s3303_s3, 128 }
  0x26   : > { %s2005_s21 = scalar_lea.hbm %s2654_s17, 64  ;;  %p2011_p0 = scmp.lt.u32.totalorder %s2654_s17, %s3303_s3 }
  0x27   : > { %p2006_p10 = scmp.ne.s32.totalorder %s2654_s17, %s2005_s21  ;;  %p2012_p1 = scmp.lt.u32.totalorder %s2010_s12, %s2005_s21 }
  0x28   : > { %p2014_p4 = scmp.lt.u32.totalorder %s2005_s21, %s2654_s17 }
  0x29   : > { %p2008_p12 = pnand %p2664_p11, %p2006_p10  ;;  %p2013_p2 = por %p2012_p1, %p2011_p0 }
  0x2b   : > { %p2009_p13 = pneg %p2008_p12  ;;  %p2015_p5 = por %p2014_p4, %p2013_p2 }
  0x2d   : > { %p2016_p7 = pnand %p2015_p5, %p2009_p13 }
  0x2f   : > { %2019 = shalt.err (!%p2016_p7)
}
  0x30   : > { %s2020_s11 = scalar_lea.vmem %s2656_s19, 64  ;;  %s2516_s16 = smov [#allocation9]  }
  0x31   : > { %p2021_p8 = scmp.ne.s32.totalorder %s2656_s19, %s2020_s11  ;;  %s2025_s18 = sshll.u32 %s2516_s16, 4  ;;  %s2026_s18 = int_to_ptr.vmem [resolvable:$false] %s2025_s18 }
  0x32   : > { %s2027_s27 = scalar_lea.vmem %s2026_s18, 128  ;;  %p2028_p6 = scmp.lt.s32.totalorder %s2656_s19, %s2026_s18 }
  0x33   : > { %p2023_p10 = pnand %p2021_p8, %p2664_p11  ;;  %p2029_p3 = scmp.lt.s32.totalorder %s2027_s27, %s2020_s11 }
  0x35   : > { %p2024_p12 = pneg %p2023_p10  ;;  %p2030_p0 = por %p2029_p3, %p2028_p6 }
  0x37   : > { %p2031_p1 = pnand %p2030_p0, %p2024_p12 }
  0x39   : > { %2034 = shalt.err (!%p2031_p1)
}
  0x3a   : > { %1808 = dma.hbm_to_vmem [thread:$0]  (!%p2646_p9), %s2654_s17, 64, %s2656_s19, %s2658_s20  }
  0x3b   : > { %s2689_s21 = sadd.s32 4294967295, %s2513_s26   ;;  %s3275_s28 = sadd.s32 4294967294, %s2513_s26  }
  0x3c   : > { %p56_p3 = scmp.ne.s32.totalorder %s2505_s24, %s2501_s23  ;;  %p3283_p6 = scmp.eq.s32.totalorder %s2689_s21, 0 }
  0x3d   : > { %p3282_p13 = scmp.eq.s32.totalorder %s2689_s21, 1  ;;  %p227_p2 = scmp.eq.s32.totalorder %s3275_s28, 1 }
  0x3e   : > { %p2700_p4 = por %p3283_p6, %p56_p3  ;;  %p1548_p5 = scmp.ge.s32.totalorder %s2513_s26, 1 }
  0x3f   : > { %p3306_p7 = scmp.ne.s32.totalorder %s2509_s25, %s2505_s24  ;;  %p2714_p10 = por %p227_p2, %p56_p3 }
  0x40   : > { %s3305_s12 = scalar_select %p2700_p4, 1, 0 }
  0x41   : > { %p2710_p8 = por %p3282_p13, %p3306_p7  ;;  %p260_p12 = scmp.lt.s32.totalorder %s2513_s26, 3 }
  0x42   : > { %s3308_s19 = scalar_select %p2714_p10, 1, 0 }
  0x43   : > { %s3307_s17 = scalar_select %p2710_p8, 1, 0 }
  0x44   : > { %3309 = sst [smem:[#allocation53_spill]] %s3308_s19  ;;  %p2719_p0 = pnand %p1548_p5, %p260_p12 }
  0x45   : > { %s2517_s14 = smov [#allocation12]   ;;  %s1551_s11 = sshll.u32 %s2642_s30, 9 }
  0x46   : > { %s3310_s23 = scalar_select %p2719_p0, 1, 0 }
  0x47   : > { %s272_s15 = sshll.u32 %s2517_s14, 4  ;;  %p1798_p1 = pneg %p2719_p0  ;;  %s2723_s15 = int_to_ptr.vmem [resolvable:$true] %s272_s15 }
  0x48   : > { %s1716_s16 = sshll.u32 %s2513_s26, 13  ;;  %s3312_s2 = sld [smem:[#allocation54_spill]] }
  0x49   : > { %p2731_p7 = pnand %p1798_p1, %p3283_p6  ;;  %s293_s29 = scalar_lea.vmem [#allocation6], %s1551_s11 }
  0x4a   : > { %s300_s25 = sshll.u32 %s293_s29, 4  ;;  %s2035_s19 = scalar_lea.hbm %s3269_s6, 1024  ;;  %s2740_s25 = int_to_ptr.vmem [resolvable:$true] %s300_s25 }
  0x4b   : > { %p2036_p3 = scmp.ne.s32.totalorder %s3269_s6, %s2035_s19  ;;  %p2037_p2 = pneg %p2731_p7 }
  0x4c   : > { %p2042_p1 = scmp.lt.u32.totalorder %s2035_s19, %s3269_s6 }
  0x4d   : > { %p2038_p5 = pnand %p2037_p2, %p2036_p3 }
  0x4e   : > { %s2738_s3 = scalar_lea.hbm %s3312_s2, %s1716_s16 }
  0x4f   : > { %p2039_p12 = pneg %p2038_p5 }
  0x51   : > { %p2044_p13 = pnand %p2042_p1, %p2039_p12 }
  0x53   : > { %2047 = shalt.err (!%p2044_p13)
}
  0x54   : > { %s2048_s29 = scalar_lea.vmem %s2723_s15, 1024  ;;  %p2056_p4 = scmp.lt.s32.totalorder %s2723_s15, %s2723_s15 }
  0x55   : > { %p2049_p6 = scmp.ne.s32.totalorder %s2723_s15, %s2048_s29  ;;  %p2057_p0 = scmp.lt.s32.totalorder %s2048_s29, %s2048_s29 }
  0x57   : > { %p2051_p10 = pnand %p2049_p6, %p2037_p2  ;;  %p2058_p9 = por %p2057_p0, %p2056_p4 }
  0x59   : > { %p2052_p8 = pneg %p2051_p10 }
  0x5b   : > { %p2059_p11 = pnand %p2058_p9, %p2052_p8 }
  0x5d   : > { %2062 = shalt.err (!%p2059_p11)
}
  0x5e   : > { %s2518_s8 = smov 64   ;;  %s2519_s10 = smov 4  }
  0x5f   : > { %1801 = dma.hbm_to_vmem [thread:$0]  (!%p2731_p7), %s3269_s6, 1024, %s2723_s15, [#allocation13], %s2518_s8, %s2518_s8, %s2519_s10  }
  0x60   : > { %s290_s11 = scalar_lea.sflag [#allocation7], %s2642_s30  ;;  %s2063_s16 = scalar_lea.hbm %s2738_s3, 8192 }
  0x61   : > { %p2064_p6 = scmp.ne.s32.totalorder %s2738_s3, %s2063_s16  ;;  %p3313_p9 = scmp.ne.s32.totalorder %s3304_s22, 0 }
  0x62   : > { %s2068_s27 = scalar_lea.hbm %s3312_s2, 16384  ;;  %p2069_p4 = scmp.lt.u32.totalorder %s2738_s3, %s3312_s2 }
  0x63   : > { %p2066_p11 = pnand %p2064_p6, %p3313_p9  ;;  %p2070_p8 = scmp.lt.u32.totalorder %s2068_s27, %s2063_s16 }
  0x64   : > { %p2072_p0 = scmp.lt.u32.totalorder %s2063_s16, %s2738_s3 }
  0x65   : > { %p2067_p13 = pneg %p2066_p11  ;;  %p2071_p10 = por %p2070_p8, %p2069_p4 }
  0x67   : > { %p2073_p3 = por %p2072_p0, %p2071_p10 }
  0x69   : > { %p2074_p2 = pnand %p2073_p3, %p2067_p13 }
  0x6b   : > { %2077 = shalt.err (!%p2074_p2)
}
  0x6c   : > { %s2078_s15 = scalar_lea.vmem %s2740_s25, 8192  ;;  %s2520_s18 = smov [#allocation6]  }
  0x6d   : > { %p2079_p7 = scmp.ne.s32.totalorder %s2740_s25, %s2078_s15  ;;  %s2083_s8 = sshll.u32 %s2520_s18, 4  ;;  %s2084_s8 = int_to_ptr.vmem [resolvable:$false] %s2083_s8 }
  0x6e   : > { %s2085_s9 = scalar_lea.vmem %s2084_s8, 16384  ;;  %p2086_p1 = scmp.lt.s32.totalorder %s2740_s25, %s2084_s8 }
  0x6f   : > { %p2081_p5 = pnand %p2079_p7, %p3313_p9  ;;  %p2087_p6 = scmp.lt.s32.totalorder %s2085_s9, %s2078_s15 }
  0x71   : > { %p2082_p12 = pneg %p2081_p5  ;;  %p2088_p11 = por %p2087_p6, %p2086_p1 }
  0x73   : > { %p2089_p4 = pnand %p2088_p11, %p2082_p12 }
  0x75   : > { %2092 = shalt.err (!%p2089_p4)
}
  0x76   : > { %s2521_s10 = smov 256   ;;  %s2522_s0 = smov 16  }
  0x77   : > { %p3314_p13 = scmp.ne.s32.totalorder %s3302_s13, 0  ;;  %s1557_s19 = sshll.u32 %s2642_s30, 3 }
  0x78   : > { %s1558_s16 = sshll.u32 %s2513_s26, 7  ;;  %s3315_s4 = sld [smem:[#allocation56_spill]] }
  0x79   : > { %1805 = dma.hbm_to_vmem [thread:$0]  (!%p3314_p13), %s2738_s3, 8192, %s2740_s25, %s290_s11, %s2521_s10, %s2521_s10, %s2522_s0  }
  0x7a   : > { %s333_s29 = scalar_lea.vmem [#allocation11], %s1557_s19 }
  0x7b   : > { %s340_s15 = sshll.u32 %s333_s29, 4  ;;  %s341_s15 = int_to_ptr.vmem [resolvable:$true] %s340_s15 }
  0x7e   : > { %s2792_s27 = scalar_lea.hbm %s3315_s4, %s1558_s16  ;;  %s2098_s30 = scalar_lea.hbm %s3315_s4, 256 }
  0x7f   : > { %s2093_s18 = scalar_lea.hbm %s2792_s27, 128  ;;  %p2099_p3 = scmp.lt.u32.totalorder %s2792_s27, %s3315_s4 }
  0x80   : > { %p2094_p8 = scmp.ne.s32.totalorder %s2792_s27, %s2093_s18  ;;  %p2100_p2 = scmp.lt.u32.totalorder %s2098_s30, %s2093_s18 }
  0x81   : > { %p2102_p5 = scmp.lt.u32.totalorder %s2093_s18, %s2792_s27 }
  0x82   : > { %p2096_p10 = pnand %p2094_p8, %p3313_p9  ;;  %p2101_p7 = por %p2100_p2, %p2099_p3 }
  0x84   : > { %p2097_p0 = pneg %p2096_p10  ;;  %p2103_p12 = por %p2102_p5, %p2101_p7 }
  0x86   : > { %p2104_p1 = pnand %p2103_p12, %p2097_p0 }
  0x88   : > { %2107 = shalt.err (!%p2104_p1)
}
  0x89   : > { %s2108_s9 = scalar_lea.vmem %s341_s15, 128  ;;  %s2523_s10 = smov [#allocation11]  }
  0x8a   : > { %p2109_p6 = scmp.ne.s32.totalorder %s341_s15, %s2108_s9  ;;  %s2113_s0 = sshll.u32 %s2523_s10, 4  ;;  %s2114_s0 = int_to_ptr.vmem [resolvable:$false] %s2113_s0 }
  0x8b   : > { %s2115_s19 = scalar_lea.vmem %s2114_s0, 256  ;;  %p2116_p8 = scmp.lt.s32.totalorder %s341_s15, %s2114_s0 }
  0x8c   : > { %p2111_p11 = pnand %p2109_p6, %p3313_p9  ;;  %p2117_p10 = scmp.lt.s32.totalorder %s2115_s19, %s2108_s9 }
  0x8e   : > { %p2112_p4 = pneg %p2111_p11  ;;  %p2118_p13 = por %p2117_p10, %p2116_p8 }
  0x90   : > { %p2119_p2 = pnand %p2118_p13, %p2112_p4 }
  0x92   : > { %2122 = shalt.err (!%p2119_p2)
}
  0x93   : > { %p3316_p3 = scmp.ne.s32.totalorder %s3302_s13, 0  ;;  %p3317_p0 = scmp.ne.s32.totalorder %s3310_s23, 0 }
  0x94   : > { %s358_s22 = sand.u32 (!%p3317_p0), 1, %s2505_s24   ;;  %p3318_p9 = scmp.ne.s32.totalorder (!%p3317_p0), %s3305_s12, 0 }
  0x95   : > { %1811 = dma.hbm_to_vmem [thread:$0]  (!%p3316_p3), %s2792_s27, 128, %s341_s15, %s2658_s20  }
  0x96   : > { %356 = sbr.rel (%p3317_p0) target bundleno = 1034 (0x40a), region = 44  ;;  %s1560_s16 = sshll.u32 (!%p3317_p0), %s358_s22, 9 }
  0x97   : > { %s359_s14 = scalar_lea.sflag (!%p3317_p0), [#allocation7], %s358_s22  ;;  %s2815_s28 = scalar_lea.vmem (!%p3317_p0), [#allocation6], %s1560_s16 }
  0x9d   : > { %2448 = dma.done.wait (%p3318_p9), %s359_s14, 8192  }
  0x9e   : > { %2450 = vsyncadd (%p3318_p9), %s359_s14, 4294959104  ;;  %s3292_s13 = sand.u32 1, %s2689_s21   ;;  %s1561_s20 = sshll.u32 %s358_s22, 2 }
  0x9f   : > { %s368_s23 = scalar_lea.sflag [#allocation10], %s3292_s13  ;;  %s2824_s27 = scalar_lea.vmem [#allocation9], %s1561_s20 }
  0xa0   : > { %2452 = dma.done.wait (%p3318_p9), %s368_s23, 192  }
  0xa1   : > { %2454 = vsyncadd (%p3318_p9), %s368_s23, 4294967104  ;;  %s2830_s29 = sshll.u32 %s358_s22, 3  ;;  %p3319_p13 = scmp.eq.s32.totalorder %s2689_s21, 0 }
  0xa3   : > { %2456 = dma.done.wait (%p3319_p13), [#allocation13], 1024   ;;  %p3320_p7 = pmov %p3319_p13 }
  0xa4   : > { %p436_p5 = scmp.lt.s32.totalorder %s2689_s21, 1  ;;  %s445_s18 = sld [smem:[#allocation5]] }
  0xa5   : > { %2458 = vsyncadd (%p3320_p7), [#allocation13], 4294966272  ;;  %s1574_s3 = sld [smem:[#allocation5 + $0x1]]  ;;  %s2524_s30 = smov [#allocation2]  }
  0xa6   : > { %s437_s25 = scalar_select %p436_p5, %s2689_s21, 1 }
  0xa7   : > { %s459_s11 = sshll.u32 %s2524_s30, 4  ;;  %s2525_s0 = smov [#allocation2 + $0x1]   ;;  %s2839_s11 = int_to_ptr.vmem [resolvable:$true] %s459_s11 }
  0xa8   : > { %s1566_s12 = sshll.u32 %s437_s25, 3  ;;  %s479_s19 = sshll.u32 %s2525_s0, 4  ;;  %s2848_s19 = int_to_ptr.vmem [resolvable:$true] %s479_s19 }
  0xa9   : > { %s2844_s10 = scalar_lea.vmem %s3268_s5, %s1566_s12  ;;  %p3321_p8 = pmov %p3320_p7 }
  0xaa   : > { %p446_p12 = scmp.gt.s32.totalorder %s445_s18, 0  ;;  %p1568_p1 = scmp.lt.s32.totalorder %s445_s18, 127 }
  0xab   : > { %p464_p6 = scmp.gt.s32.totalorder %s1574_s3, 0  ;;  %p1575_p11 = scmp.lt.s32.totalorder %s1574_s3, 127 }
  0xac   : > { %s3387_s18 = smov (!%p446_p12, %s445_s18), 0  ;;  %s2859_s8 = scalar_lea.hbm %s3264_s1, 2048 }
  0xad   : > { %s3389_s3 = smov (!%p464_p6, %s1574_s3), 0  ;;  %s3391_s18 = smov (!%p1568_p1, %s3387_s18), 127 }
  0xae   : > { %s3393_s3 = smov (!%p1575_p11, %s3389_s3), 127  ;;  %s1573_s22 = sshll.u32 %s3391_s18, 4 }
  0xaf   : > { %s451_s20 = scalar_lea.hbm %s3264_s1, %s1573_s22  ;;  %s1580_s23 = sshll.u32 %s3393_s3, 4 }
  0xb0   : > { %s2123_s25 = scalar_lea.hbm %s451_s20, 16  ;;  %p2128_p3 = scmp.lt.u32.totalorder %s451_s20, %s3264_s1 }
  0xb1   : > { %p2124_p4 = scmp.ne.s32.totalorder %s451_s20, %s2123_s25  ;;  %p2129_p0 = scmp.lt.u32.totalorder %s2859_s8, %s2123_s25 }
  0xb2   : > { %p2131_p13 = scmp.lt.u32.totalorder %s2123_s25, %s451_s20 }
  0xb3   : > { %p2125_p10 = pnand %p2124_p4, %p3321_p8  ;;  %p2130_p9 = por %p2129_p0, %p2128_p3 }
  0xb5   : > { %p2126_p2 = pneg %p2125_p10  ;;  %p2132_p7 = por %p2131_p13, %p2130_p9 }
  0xb7   : > { %p2133_p5 = pnand %p2132_p7, %p2126_p2 }
  0xb9   : > { %2136 = shalt.err (!%p2133_p5)  }
  0xba   : > { %s2137_s18 = scalar_lea.vmem %s2839_s11, 16  ;;  %p3322_p1 = pmov %p3321_p8 }
  0xbb   : > { %p2138_p12 = scmp.ne.s32.totalorder %s2839_s11, %s2137_s18  ;;  %s2870_s3 = scalar_lea.vmem %s2839_s11, 128 }
  0xbc   : > { %p2144_p4 = scmp.lt.s32.totalorder %s2839_s11, %s2839_s11  ;;  %p2145_p8 = scmp.lt.s32.totalorder %s2870_s3, %s2137_s18 }
  0xbd   : > { %p2139_p6 = pnand %p2138_p12, %p3322_p1 }
  0xbe   : > { %p2146_p10 = por %p2145_p8, %p2144_p4 }
  0xbf   : > { %p2140_p11 = pneg %p2139_p6 }
  0xc1   : > { %p2147_p3 = pnand %p2146_p10, %p2140_p11 }
  0xc3   : > { %2150 = shalt.err (!%p2147_p3)  }
  0xc4   : > { %p3323_p2 = pmov %p3322_p1  ;;  %s469_s14 = scalar_lea.hbm %s3264_s1, %s1580_s23 }
  0xc5   : > { %s2881_s25 = sld [smem:[#allocation5 + $0x2]]  ;;  %s2151_s30 = scalar_lea.hbm %s469_s14, 16 }
  0xc6   : > { %1774 = dma.hbm_to_vmem [thread:$0]  (%p3323_p2), %s451_s20, 16, %s2839_s11, [#allocation3] }
  0xc7   : > { %p2152_p0 = scmp.ne.s32.totalorder %s469_s14, %s2151_s30  ;;  %p3324_p9 = pmov %p3322_p1 }
  0xc8   : > { %p2156_p5 = scmp.lt.u32.totalorder %s469_s14, %s3264_s1  ;;  %p2157_p12 = scmp.lt.u32.totalorder %s2859_s8, %s2151_s30 }
  0xc9   : > { %p2153_p13 = pnand %p2152_p0, %p3324_p9  ;;  %p2159_p6 = scmp.lt.u32.totalorder %s2151_s30, %s469_s14 }
  0xca   : > { %p2158_p1 = por %p2157_p12, %p2156_p5 }
  0xcb   : > { %p2154_p7 = pneg %p2153_p13 }
  0xcc   : > { %p2160_p11 = por %p2159_p6, %p2158_p1 }
  0xce   : > { %p2161_p4 = pnand %p2160_p11, %p2154_p7 }
  0xd0   : > { %2164 = shalt.err (!%p2161_p4)  }
  0xd1   : > { %s2165_s20 = scalar_lea.vmem %s2848_s19, 16  ;;  %p3325_p10 = pmov %p3323_p2 }
  0xd2   : > { %p2166_p8 = scmp.ne.s32.totalorder %s2848_s19, %s2165_s20  ;;  %p2172_p0 = scmp.lt.s32.totalorder %s2848_s19, %s2839_s11 }
  0xd3   : > { %p2173_p9 = scmp.lt.s32.totalorder %s2870_s3, %s2165_s20 }
  0xd4   : > { %p2167_p3 = pnand %p2166_p8, %p3325_p10 }
  0xd5   : > { %p2174_p13 = por %p2173_p9, %p2172_p0 }
  0xd6   : > { %p2168_p2 = pneg %p2167_p3 }
  0xd8   : > { %p2175_p5 = pnand %p2174_p13, %p2168_p2 }
  0xda   : > { %2178 = shalt.err (!%p2175_p5)  }
  0xdb   : > { %p3326_p12 = pmov %p3325_p10  ;;  %s2899_s23 = sld [smem:[#allocation5 + $0x3]] }
  0xdc   : > { %s2526_s0 = smov [#allocation2 + $0x2]   ;;  %s2527_s22 = smov [#allocation2 + $0x3]  }
  0xdd   : > { %1775 = dma.hbm_to_vmem [thread:$0]  (%p3326_p12), %s469_s14, 16, %s2848_s19, [#allocation3 + $0x1] }
  0xde   : > { %s499_s18 = sshll.u32 %s2526_s0, 4  ;;  %s519_s16 = sshll.u32 %s2527_s22, 4  ;;  %s2901_s18 = int_to_ptr.vmem [resolvable:$true] %s499_s18  ;;  %s2903_s16 = int_to_ptr.vmem [resolvable:$true] %s519_s16 }
  0xdf   : > { %s2905_s30 = sld [smem:[#allocation5 + $0x4]]  ;;  %p484_p7 = scmp.gt.s32.totalorder %s2881_s25, 0 }
  0xe0   : > { %p1582_p1 = scmp.lt.s32.totalorder %s2881_s25, 127  ;;  %s2909_s19 = sld [smem:[#allocation5 + $0x5]] }
  0xe1   : > { %s3395_s25 = smov (!%p484_p7, %s2881_s25), 0  ;;  %p504_p6 = scmp.gt.s32.totalorder %s2899_s23, 0 }
  0xe2   : > { %s3397_s25 = smov (!%p1582_p1, %s3395_s25), 127  ;;  %p3327_p3 = pmov %p3326_p12 }
  0xe3   : > { %s505_s14 = scalar_select %p504_p6, %s2899_s23, 0 }
  0xe4   : > { %s1587_s12 = sshll.u32 %s3397_s25, 4 }
  0xe5   : > { %s489_s0 = scalar_lea.hbm %s3264_s1, %s1587_s12 }
  0xe6   : > { %s2179_s22 = scalar_lea.hbm %s489_s0, 16  ;;  %p2184_p9 = scmp.lt.u32.totalorder %s489_s0, %s3264_s1 }
  0xe7   : > { %p2180_p10 = scmp.ne.s32.totalorder %s489_s0, %s2179_s22  ;;  %p2185_p13 = scmp.lt.u32.totalorder %s2859_s8, %s2179_s22 }
  0xe8   : > { %p2187_p12 = scmp.lt.u32.totalorder %s2179_s22, %s489_s0 }
  0xe9   : > { %p2181_p2 = pnand %p2180_p10, %p3327_p3  ;;  %p2186_p5 = por %p2185_p13, %p2184_p9 }
  0xeb   : > { %p2182_p0 = pneg %p2181_p2  ;;  %p2188_p7 = por %p2187_p12, %p2186_p5 }
  0xed   : > { %p2189_p1 = pnand %p2188_p7, %p2182_p0 }
  0xef   : > { %2192 = shalt.err (!%p2189_p1)  }
  0xf0   : > { %s2193_s25 = scalar_lea.vmem %s2901_s18, 16  ;;  %p3328_p10 = pmov %p3327_p3 }
  0xf1   : > { %p2194_p6 = scmp.ne.s32.totalorder %s2901_s18, %s2193_s25  ;;  %p2200_p8 = scmp.lt.s32.totalorder %s2901_s18, %s2839_s11 }
  0xf2   : > { %p2201_p4 = scmp.lt.s32.totalorder %s2870_s3, %s2193_s25 }
  0xf3   : > { %p2195_p3 = pnand %p2194_p6, %p3328_p10 }
  0xf4   : > { %p2202_p11 = por %p2201_p4, %p2200_p8 }
  0xf5   : > { %p2196_p2 = pneg %p2195_p3 }
  0xf7   : > { %p2203_p9 = pnand %p2202_p11, %p2196_p2 }
  0xf9   : > { %2206 = shalt.err (!%p2203_p9)  }
  0xfa   : > { %p3329_p13 = pmov %p3328_p10  ;;  %p3330_p0 = scmp.lt.s32.totalorder %s2899_s23, 127 }
  0xfb   : > { %p3331_p5 = scmp.gt.s32.totalorder %s2905_s30, 0  ;;  %s2528_s12 = smov [#allocation2 + $0x4]  }
  0xfc   : > { %1776 = dma.hbm_to_vmem [thread:$0]  (%p3329_p13), %s489_s0, 16, %s2901_s18, [#allocation3 + $0x2] }
  0xfd   : > { %s3399_s14 = smov (!%p3330_p0, %s505_s14), 127  ;;  %s539_s9 = sshll.u32 %s2528_s12, 4  ;;  %s2944_s9 = int_to_ptr.vmem [resolvable:$true] %s539_s9 }
  0xfe   : > { %s525_s13 = scalar_select %p3331_p5, %s2905_s30, 0 }
  0xff   : > { %s1594_s15 = sshll.u32 %s3399_s14, 4  ;;  %p3332_p4 = pmov %p3328_p10 }
 0x100   : > { %s509_s25 = scalar_lea.hbm %s3264_s1, %s1594_s15 }
 0x101   : > { %s2207_s2 = scalar_lea.hbm %s509_s25, 16  ;;  %p2212_p7 = scmp.lt.u32.totalorder %s509_s25, %s3264_s1 }
 0x102   : > { %p2208_p11 = scmp.ne.s32.totalorder %s509_s25, %s2207_s2  ;;  %p2213_p1 = scmp.lt.u32.totalorder %s2859_s8, %s2207_s2 }
 0x103   : > { %p2215_p10 = scmp.lt.u32.totalorder %s2207_s2, %s509_s25 }
 0x104   : > { %p2209_p8 = pnand %p2208_p11, %p3332_p4  ;;  %p2214_p6 = por %p2213_p1, %p2212_p7 }
 0x106   : > { %p2210_p12 = pneg %p2209_p8  ;;  %p2216_p3 = por %p2215_p10, %p2214_p6 }
 0x108   : > { %p2217_p2 = pnand %p2216_p3, %p2210_p12 }
 0x10a   : > { %2220 = shalt.err (!%p2217_p2)  }
 0x10b   : > { %s2221_s23 = scalar_lea.vmem %s2903_s16, 16  ;;  %p3333_p13 = pmov %p3332_p4 }
 0x10c   : > { %p2222_p9 = scmp.ne.s32.totalorder %s2903_s16, %s2221_s23  ;;  %p2228_p11 = scmp.lt.s32.totalorder %s2903_s16, %s2839_s11 }
 0x10d   : > { %p2229_p4 = scmp.lt.s32.totalorder %s2870_s3, %s2221_s23 }
 0x10e   : > { %p2223_p0 = pnand %p2222_p9, %p3333_p13 }
 0x10f   : > { %p2230_p8 = por %p2229_p4, %p2228_p11 }
 0x110   : > { %p2224_p5 = pneg %p2223_p0 }
 0x112   : > { %p2231_p1 = pnand %p2230_p8, %p2224_p5 }
 0x114   : > { %2234 = shalt.err (!%p2231_p1)  }
 0x115   : > { %p3334_p7 = pmov %p3333_p13  ;;  %p3335_p12 = scmp.lt.s32.totalorder %s2905_s30, 127 }
 0x116   : > { %s2529_s15 = smov [#allocation2 + $0x5]  }
 0x117   : > { %1777 = dma.hbm_to_vmem [thread:$0]  (%p3334_p7), %s509_s25, 16, %s2903_s16, [#allocation3 + $0x3] }
 0x118   : > { %s3401_s13 = smov (!%p3335_p12, %s525_s13), 127  ;;  %s559_s12 = sshll.u32 %s2529_s15, 4  ;;  %s560_s12 = int_to_ptr.vmem [resolvable:$true] %s559_s12 }
 0x119   : > { %s1601_s2 = sshll.u32 %s3401_s13, 4  ;;  %p3336_p2 = pmov %p3334_p7 }
 0x11a   : > { %s529_s0 = scalar_lea.hbm %s3264_s1, %s1601_s2 }
 0x11b   : > { %s2235_s20 = scalar_lea.hbm %s529_s0, 16  ;;  %p2240_p0 = scmp.lt.u32.totalorder %s529_s0, %s3264_s1 }
 0x11c   : > { %p2236_p3 = scmp.ne.s32.totalorder %s529_s0, %s2235_s20  ;;  %p2241_p5 = scmp.lt.u32.totalorder %s2859_s8, %s2235_s20 }
 0x11d   : > { %p2243_p4 = scmp.lt.u32.totalorder %s2235_s20, %s529_s0 }
 0x11e   : > { %p2237_p9 = pnand %p2236_p3, %p3336_p2  ;;  %p2242_p11 = por %p2241_p5, %p2240_p0 }
 0x120   : > { %p2238_p13 = pneg %p2237_p9  ;;  %p2244_p8 = por %p2243_p4, %p2242_p11 }
 0x122   : > { %p2245_p1 = pnand %p2244_p8, %p2238_p13 }
 0x124   : > { %2248 = shalt.err (!%p2245_p1)  }
 0x125   : > { %s2249_s16 = scalar_lea.vmem %s2944_s9, 16  ;;  %p3337_p12 = pmov %p3336_p2 }
 0x126   : > { %p2250_p7 = scmp.ne.s32.totalorder %s2944_s9, %s2249_s16  ;;  %p2256_p9 = scmp.lt.s32.totalorder %s2944_s9, %s2839_s11 }
 0x127   : > { %p2257_p10 = scmp.lt.s32.totalorder %s2870_s3, %s2249_s16 }
 0x128   : > { %p2251_p3 = pnand %p2250_p7, %p3337_p12 }
 0x129   : > { %p2258_p6 = por %p2257_p10, %p2256_p9 }
 0x12a   : > { %p2252_p2 = pneg %p2251_p3 }
 0x12c   : > { %p2259_p0 = pnand %p2258_p6, %p2252_p2 }
 0x12e   : > { %2262 = shalt.err (!%p2259_p0)  }
 0x12f   : > { %p3338_p5 = pmov %p3337_p12  ;;  %p3339_p13 = scmp.gt.s32.totalorder %s2909_s19, 0 }
 0x130   : > { %s2988_s13 = sld [smem:[#allocation5 + $0x6]]  ;;  %p3340_p11 = scmp.lt.s32.totalorder %s2909_s19, 127 }
 0x131   : > { %1778 = dma.hbm_to_vmem [thread:$0]  (%p3338_p5), %s529_s0, 16, %s2944_s9, [#allocation3 + $0x4] }
 0x132   : > { %s545_s30 = scalar_select %p3339_p13, %s2909_s19, 0 }
 0x133   : > { %s2992_s25 = sld [smem:[#allocation5 + $0x7]]  ;;  %s2530_s15 = smov [#allocation2 + $0x6]  }
 0x134   : > { %s3403_s30 = smov (!%p3340_p11, %s545_s30), 127  ;;  %s579_s20 = sshll.u32 %s2530_s15, 4  ;;  %s3011_s20 = int_to_ptr.vmem [resolvable:$true] %s579_s20 }
 0x135   : > { %s1608_s23 = sshll.u32 %s3403_s30, 4  ;;  %p3341_p10 = pmov %p3338_p5 }
 0x136   : > { %s549_s14 = scalar_lea.hbm %s3264_s1, %s1608_s23 }
 0x137   : > { %s2263_s22 = scalar_lea.hbm %s549_s14, 16  ;;  %p2268_p1 = scmp.lt.u32.totalorder %s549_s14, %s3264_s1 }
 0x138   : > { %p2264_p6 = scmp.ne.s32.totalorder %s549_s14, %s2263_s22  ;;  %p2269_p7 = scmp.lt.u32.totalorder %s2859_s8, %s2263_s22 }
 0x139   : > { %p2271_p3 = scmp.lt.u32.totalorder %s2263_s22, %s549_s14 }
 0x13a   : > { %p2265_p4 = pnand %p2264_p6, %p3341_p10  ;;  %p2270_p12 = por %p2269_p7, %p2268_p1 }
 0x13c   : > { %p2266_p8 = pneg %p2265_p4  ;;  %p2272_p2 = por %p2271_p3, %p2270_p12 }
 0x13e   : > { %p2273_p9 = pnand %p2272_p2, %p2266_p8 }
 0x140   : > { %2276 = shalt.err (!%p2273_p9)  }
 0x141   : > { %s2277_s19 = scalar_lea.vmem %s560_s12, 16  ;;  %p2284_p6 = scmp.lt.s32.totalorder %s560_s12, %s2839_s11 }
 0x142   : > { %p2278_p0 = scmp.ne.s32.totalorder %s560_s12, %s2277_s19  ;;  %p2285_p10 = scmp.lt.s32.totalorder %s2870_s3, %s2277_s19 }
 0x144   : > { %p2279_p13 = pnand %p2278_p0, %p3338_p5  ;;  %p2286_p4 = por %p2285_p10, %p2284_p6 }
 0x146   : > { %p2280_p11 = pneg %p2279_p13 }
 0x148   : > { %p2287_p1 = pnand %p2286_p4, %p2280_p11 }
 0x14a   : > { %2290 = shalt.err (!%p2287_p1)  }
 0x14b   : > { %p3342_p7 = pmov %p3338_p5  ;;  %p564_p8 = scmp.gt.s32.totalorder %s2988_s13, 0 }
 0x14c   : > { %p1610_p12 = scmp.lt.s32.totalorder %s2988_s13, 127  ;;  %p584_p3 = scmp.gt.s32.totalorder %s2992_s25, 0 }
 0x14d   : > { %1779 = dma.hbm_to_vmem [thread:$0]  (%p3342_p7), %s549_s14, 16, %s560_s12, [#allocation3 + $0x5] }
 0x14e   : > { %s3405_s13 = smov (!%p564_p8, %s2988_s13), 0  ;;  %s2531_s4 = smov [#allocation2 + $0x7]  }
 0x14f   : > { %s3407_s13 = smov (!%p1610_p12, %s3405_s13), 127  ;;  %s599_s15 = sshll.u32 %s2531_s4, 4  ;;  %s600_s15 = int_to_ptr.vmem [resolvable:$true] %s599_s15 }
 0x150   : > { %s585_s18 = scalar_select %p584_p3, %s2992_s25, 0 }
 0x151   : > { %s1615_s16 = sshll.u32 %s3407_s13, 4  ;;  %p3343_p0 = pmov %p3338_p5 }
 0x152   : > { %s569_s2 = scalar_lea.hbm %s3264_s1, %s1615_s16 }
 0x153   : > { %s2291_s22 = scalar_lea.hbm %s569_s2, 16  ;;  %p2296_p11 = scmp.lt.u32.totalorder %s569_s2, %s3264_s1 }
 0x154   : > { %p2292_p9 = scmp.ne.s32.totalorder %s569_s2, %s2291_s22  ;;  %p2297_p6 = scmp.lt.u32.totalorder %s2859_s8, %s2291_s22 }
 0x155   : > { %p2299_p4 = scmp.lt.u32.totalorder %s2291_s22, %s569_s2 }
 0x156   : > { %p2293_p5 = pnand %p2292_p9, %p3343_p0  ;;  %p2298_p10 = por %p2297_p6, %p2296_p11 }
 0x158   : > { %p2294_p13 = pneg %p2293_p5  ;;  %p2300_p1 = por %p2299_p4, %p2298_p10 }
 0x15a   : > { %p2301_p7 = pnand %p2300_p1, %p2294_p13 }
 0x15c   : > { %2304 = shalt.err (!%p2301_p7)  }
 0x15d   : > { %s2305_s13 = scalar_lea.vmem %s3011_s20, 16  ;;  %p3344_p12 = pmov %p3343_p0 }
 0x15e   : > { %p2306_p8 = scmp.ne.s32.totalorder %s3011_s20, %s2305_s13  ;;  %p2312_p0 = scmp.lt.s32.totalorder %s3011_s20, %s2839_s11 }
 0x15f   : > { %p2313_p5 = scmp.lt.s32.totalorder %s2870_s3, %s2305_s13 }
 0x160   : > { %p2307_p3 = pnand %p2306_p8, %p3344_p12 }
 0x161   : > { %p2314_p2 = por %p2313_p5, %p2312_p0 }
 0x162   : > { %p2308_p9 = pneg %p2307_p3 }
 0x164   : > { %p2315_p6 = pnand %p2314_p2, %p2308_p9 }
 0x166   : > { %2318 = shalt.err (!%p2315_p6)  }
 0x167   : > { %p3345_p11 = pmov %p3344_p12  ;;  %p3346_p13 = scmp.lt.s32.totalorder %s2992_s25, 127 }
 0x169   : > { %1780 = dma.hbm_to_vmem [thread:$0]  (%p3345_p11), %s569_s2, 16, %s3011_s20, [#allocation3 + $0x6] }
 0x16a   : > { %s3409_s18 = smov (!%p3346_p13, %s585_s18), 127  ;;  %p3347_p4 = pmov %p3345_p11 }
 0x16b   : > { %s1622_s9 = sshll.u32 %s3409_s18, 4 }
 0x16c   : > { %s589_s16 = scalar_lea.hbm %s3264_s1, %s1622_s9 }
 0x16d   : > { %s2319_s30 = scalar_lea.hbm %s589_s16, 16  ;;  %p2324_p7 = scmp.lt.u32.totalorder %s589_s16, %s3264_s1 }
 0x16e   : > { %p2320_p10 = scmp.ne.s32.totalorder %s589_s16, %s2319_s30  ;;  %p2325_p8 = scmp.lt.u32.totalorder %s2859_s8, %s2319_s30 }
 0x16f   : > { %p2327_p3 = scmp.lt.u32.totalorder %s2319_s30, %s589_s16 }
 0x170   : > { %p2321_p2 = pnand %p2320_p10, %p3347_p4  ;;  %p2326_p12 = por %p2325_p8, %p2324_p7 }
 0x172   : > { %p2322_p1 = pneg %p2321_p2  ;;  %p2328_p9 = por %p2327_p3, %p2326_p12 }
 0x174   : > { %p2329_p0 = pnand %p2328_p9, %p2322_p1 }
 0x176   : > { %2332 = shalt.err (!%p2329_p0)  }
 0x177   : > { %s2333_s25 = scalar_lea.vmem %s600_s15, 16  ;;  %p3348_p6 = pmov %p3347_p4 }
 0x178   : > { %p2334_p5 = scmp.ne.s32.totalorder %s600_s15, %s2333_s25  ;;  %p2340_p10 = scmp.lt.s32.totalorder %s600_s15, %s2839_s11 }
 0x179   : > { %p2341_p4 = scmp.lt.s32.totalorder %s2870_s3, %s2333_s25 }
 0x17a   : > { %p2335_p11 = pnand %p2334_p5, %p3348_p6 }
 0x17b   : > { %p2342_p2 = por %p2341_p4, %p2340_p10 }
 0x17c   : > { %p2336_p13 = pneg %p2335_p11 }
 0x17e   : > { %p2343_p7 = pnand %p2342_p2, %p2336_p13 }
 0x180   : > { %2346 = shalt.err (!%p2343_p7)  }
 0x181   : > { %p3349_p8 = pmov %p3348_p6  ;;  %s428_s8 = scalar_lea.vmem [#allocation15], %s2830_s29 }
 0x182   : > { %s435_s20 = scalar_lea.vmem [#allocation17], %s2830_s29  ;;  %p3350_p1 = pmov %p3348_p6 }
 0x183   : > { %1781 = dma.hbm_to_vmem [thread:$0]  (%p3349_p8), %s589_s16, 16, %s600_s15, [#allocation3 + $0x7] }
 0x184   : > { %2460 = dma.done.wait (%p3350_p1), [#allocation3], 16  ;;  %p3351_p12 = pmov %p3350_p1 }
 0x185   : > { %p3352_p3 = pmov %p3350_p1 }
 0x186   : > { %2462 = vsyncadd (%p3351_p12), [#allocation3], 4294967280 }
 0x187   : > { %2464 = dma.done.wait (%p3352_p3), [#allocation3 + $0x1], 16  ;;  %p3353_p9 = pmov %p3350_p1 }
 0x188   : > { %p3354_p0 = pmov %p3350_p1 }
 0x189   : > { %2466 = vsyncadd (%p3353_p9), [#allocation3 + $0x1], 4294967280 }
 0x18a   : > { %2468 = dma.done.wait (%p3354_p0), [#allocation3 + $0x2], 16  ;;  %p3355_p5 = pmov %p3354_p0 }
 0x18b   : > { %p3356_p6 = pmov %p3354_p0 }
 0x18c   : > { %2470 = vsyncadd (%p3355_p5), [#allocation3 + $0x2], 4294967280 }
 0x18d   : > { %2472 = dma.done.wait (%p3356_p6), [#allocation3 + $0x3], 16  ;;  %p3357_p11 = pmov %p3354_p0 }
 0x18e   : > { %p3358_p13 = pmov %p3354_p0 }
 0x18f   : > { %2474 = vsyncadd (%p3357_p11), [#allocation3 + $0x3], 4294967280 }
 0x190   : > { %2476 = dma.done.wait (%p3358_p13), [#allocation3 + $0x4], 16  ;;  %p3359_p10 = pmov %p3354_p0 }
 0x191   : > { %p3360_p4 = pmov %p3354_p0 }
 0x192   : > { %2478 = vsyncadd (%p3359_p10), [#allocation3 + $0x4], 4294967280 }
 0x193   : > { %2480 = dma.done.wait (%p3360_p4), [#allocation3 + $0x5], 16  ;;  %p3361_p2 = pmov %p3354_p0 }
 0x194   : > { %p3362_p7 = pmov %p3354_p0 }
 0x195   : > { %2482 = vsyncadd (%p3361_p2), [#allocation3 + $0x5], 4294967280 }
 0x196   : > { %2484 = dma.done.wait (%p3362_p7), [#allocation3 + $0x6], 16  ;;  %p3363_p8 = pmov %p3354_p0 }
 0x197   : > { %p3364_p1 = pmov %p3354_p0 }
 0x198   : > { %2486 = vsyncadd (%p3363_p8), [#allocation3 + $0x6], 4294967280 }
 0x199   : > { %2488 = dma.done.wait (%p3364_p1), [#allocation3 + $0x7], 16  ;;  %p3365_p12 = pmov %p3354_p0 }
 0x19a   : > { %v1875_v0 = vld [vmem:[%s2815_s28 + $0x4] ss:$16 sps:$4 sm:$0xff]   ;;  %v1877_v1 = vld [vmem:[%s2815_s28] ss:$16 sps:$4 sm:$0xff]   ;;  %v1886_v5 = vld [vmem:[%s2815_s28 + $0xc] ss:$16 sps:$4 sm:$0xff]  }
 0x19b   : > { %2490 = vsyncadd (%p3365_p12), [#allocation3 + $0x7], 4294967280  ;;  %1030 = vmatprep.subr.bf16.mxu0 %v1875_v0  ;;  %v1878_v2 = vld [vmem:[%s2815_s28 + $0x24] ss:$16 sps:$4 sm:$0xff]   ;;  %v1880_v3 = vld [vmem:[%s2815_s28 + $0x20] ss:$16 sps:$4 sm:$0xff]   ;;  %1071 = vmatprep.subr.bf16.mxu1 %v1886_v5 }
 0x19c   : > { %1031 = vmatpush1.bf16.msra.mxu0 %v1877_v1  ;;  %v1881_v4 = vld [vmem:[%s2815_s28 + $0x44] ss:$16 sps:$4 sm:$0xff]   ;;  %v1889_v6 = vld [vmem:[%s2815_s28 + $0x8] ss:$16 sps:$4 sm:$0xff]   ;;  %v1883_v7 = vld [vmem:[%s2815_s28 + $0x40] ss:$16 sps:$4 sm:$0xff]  }
 0x19d   : > { %1032 = vmatprep.subr.bf16.mxu0 %v1878_v2  ;;  %v1884_v8 = vld [vmem:[%s2815_s28 + $0x64] ss:$16 sps:$4 sm:$0xff]   ;;  %1072 = vmatpush1.bf16.msra.mxu1 %v1889_v6  ;;  %v1892_v9 = vld [vmem:[%s2815_s28 + $0x2c] ss:$16 sps:$4 sm:$0xff]   ;;  %v1895_v10 = vld [vmem:[%s2815_s28 + $0x28] ss:$16 sps:$4 sm:$0xff]  }
 0x19e   : > { %1073 = vmatprep.subr.bf16.mxu1 %v1892_v9  ;;  %v1888_v11 = vld [vmem:[%s2815_s28 + $0x60] ss:$16 sps:$4 sm:$0xff]   ;;  %v1890_v12 = vld [vmem:[%s2815_s28 + $0x84] ss:$16 sps:$4 sm:$0xff]   ;;  %v1898_v13 = vld [vmem:[%s2815_s28 + $0x4c] ss:$16 sps:$4 sm:$0xff]  }
 0x19f   : > { %v1901_v14 = vld [vmem:[%s2815_s28 + $0x48] ss:$16 sps:$4 sm:$0xff]   ;;  %v1904_v15 = vld [vmem:[%s2815_s28 + $0x6c] ss:$16 sps:$4 sm:$0xff]   ;;  %v1894_v16 = vld [vmem:[%s2815_s28 + $0x80] ss:$16 sps:$4 sm:$0xff]  }
 0x1a0   : > { %1033 = vmatpush1.bf16.msra.mxu0 %v1880_v3  ;;  %v1896_v17 = vld [vmem:[%s2815_s28 + $0xa4] ss:$16 sps:$4 sm:$0xff]   ;;  %v1907_v18 = vld [vmem:[%s2815_s28 + $0x68] ss:$16 sps:$4 sm:$0xff]   ;;  %v1910_v19 = vld [vmem:[%s2815_s28 + $0x8c] ss:$16 sps:$4 sm:$0xff]  }
 0x1a1   : > { %1034 = vmatprep.subr.bf16.mxu0 %v1881_v4  ;;  %1074 = vmatpush1.bf16.msra.mxu1 %v1895_v10  ;;  %v1900_v20 = vld [vmem:[%s2815_s28 + $0xa0] ss:$16 sps:$4 sm:$0xff]   ;;  %v1902_v21 = vld [vmem:[%s2815_s28 + $0xc4] ss:$16 sps:$4 sm:$0xff]   ;;  %v1913_v22 = vld [vmem:[%s2815_s28 + $0x88] ss:$16 sps:$4 sm:$0xff]   ;;  %v690_v4 = vlaneseq }
 0x1a2   : > { %1075 = vmatprep.subr.bf16.mxu1 %v1898_v13  ;;  %v1916_v23 = vld [vmem:[%s2815_s28 + $0xac] ss:$16 sps:$4 sm:$0xff]   ;;  %v1906_v24 = vld [vmem:[%s2815_s28 + $0xc0] ss:$16 sps:$4 sm:$0xff]   ;;  %v1908_v25 = vld [vmem:[%s2815_s28 + $0xe4] ss:$16 sps:$4 sm:$0xff]  }
 0x1a3   : > { %v1919_v26 = vld [vmem:[%s2815_s28 + $0xa8] ss:$16 sps:$4 sm:$0xff]   ;;  %v1922_v27 = vld [vmem:[%s2815_s28 + $0xcc] ss:$16 sps:$4 sm:$0xff]   ;;  %v1912_v28 = vld [vmem:[%s2815_s28 + $0xe0] ss:$16 sps:$4 sm:$0xff]  }
 0x1a4   : > { %1035 = vmatpush1.bf16.msra.mxu0 %v1883_v7  ;;  %v1914_v29 = vld [vmem:[%s2815_s28 + $0x104] ss:$16 sps:$4 sm:$0xff]   ;;  %v1925_v30 = vld [vmem:[%s2815_s28 + $0xc8] ss:$16 sps:$4 sm:$0xff]   ;;  %v1928_v31 = vld [vmem:[%s2815_s28 + $0xec] ss:$16 sps:$4 sm:$0xff]  }
 0x1a5   : > { %1036 = vmatprep.subr.bf16.mxu0 %v1884_v8  ;;  %1076 = vmatpush1.bf16.msra.mxu1 %v1901_v14  ;;  %v1918_v32 = vld [vmem:[%s2815_s28 + $0x100] ss:$16 sps:$4 sm:$0xff]   ;;  %v1920_v33 = vld [vmem:[%s2815_s28 + $0x124] ss:$16 sps:$4 sm:$0xff]   ;;  %v1931_v34 = vld [vmem:[%s2815_s28 + $0xe8] ss:$16 sps:$4 sm:$0xff]  }
 0x1a6   : > { %1077 = vmatprep.subr.bf16.mxu1 %v1904_v15  ;;  %v1934_v35 = vld [vmem:[%s2815_s28 + $0x10c] ss:$16 sps:$4 sm:$0xff]   ;;  %v1924_v36 = vld [vmem:[%s2815_s28 + $0x120] ss:$16 sps:$4 sm:$0xff]   ;;  %v1926_v37 = vld [vmem:[%s2815_s28 + $0x144] ss:$16 sps:$4 sm:$0xff]  }
 0x1a7   : > { %v1937_v38 = vld [vmem:[%s2815_s28 + $0x108] ss:$16 sps:$4 sm:$0xff]   ;;  %v1940_v39 = vld [vmem:[%s2815_s28 + $0x12c] ss:$16 sps:$4 sm:$0xff]   ;;  %s3366_s11 = scalar_lea.vmem [#allocation11], %s2830_s29  ;;  %v691_v5 = vshrl.u32 %v690_v4, 7 }
 0x1a8   : > { %1037 = vmatpush1.bf16.msra.mxu0 %v1888_v11  ;;  %v620_v40 = vld [vmem:[%s3366_s11] sm:$0xff]  ;;  %v619_v63 = vld [vmem:[#allocation2] sm:$0xff]  ;;  %v688_v7 = vld [vmem:[%s2824_s27] sm:$0xf]  ;;  %p1690_p3 = scmp.ne.s32.totalorder %s2689_s21, 1 }
 0x1a9   : > { %1038 = vmatprep.subr.bf16.mxu0 %v1890_v12  ;;  %1078 = vmatpush1.bf16.msra.mxu1 %v1907_v18  ;;  %v1930_v41 = vld [vmem:[%s2815_s28 + $0x140] ss:$16 sps:$4 sm:$0xff]   ;;  %v623_v42 = vpack.c.bf16 %v620_v40, %v620_v40  ;;  %v1932_v43 = vld [vmem:[%s2815_s28 + $0x164] ss:$16 sps:$4 sm:$0xff]   ;;  %v1943_v44 = vld [vmem:[%s2815_s28 + $0x128] ss:$16 sps:$4 sm:$0xff]   ;;  %v622_v2 = vpack.c.bf16 %v619_v63, %v619_v63 }
 0x1aa   : > { %1079 = vmatprep.subr.bf16.mxu1 %v1910_v19  ;;  %v1946_v45 = vld [vmem:[%s2815_s28 + $0x14c] ss:$16 sps:$4 sm:$0xff]   ;;  %v1936_v46 = vld [vmem:[%s2815_s28 + $0x160] ss:$16 sps:$4 sm:$0xff]   ;;  %v1938_v47 = vld [vmem:[%s2815_s28 + $0x184] ss:$16 sps:$4 sm:$0xff]  }
 0x1ab   : > { %1062 = vmatprep.mubr.bf16.mxu0 %v623_v42  ;;  %1103 = vmatprep.mubr.bf16.mxu1 %v623_v42  ;;  %v1949_v48 = vld [vmem:[%s2815_s28 + $0x148] ss:$16 sps:$4 sm:$0xff]   ;;  %v1952_v49 = vld [vmem:[%s2815_s28 + $0x16c] ss:$16 sps:$4 sm:$0xff]   ;;  %v1942_v50 = vld [vmem:[%s2815_s28 + $0x180] ss:$16 sps:$4 sm:$0xff]  }
 0x1ac   : > { %1039 = vmatpush1.bf16.msra.mxu0 %v1894_v16  ;;  %v1944_v51 = vld [vmem:[%s2815_s28 + $0x1a4] ss:$16 sps:$4 sm:$0xff]   ;;  %v1955_v52 = vld [vmem:[%s2815_s28 + $0x168] ss:$16 sps:$4 sm:$0xff]   ;;  %v1958_v53 = vld [vmem:[%s2815_s28 + $0x18c] ss:$16 sps:$4 sm:$0xff]  }
 0x1ad   : > { %1040 = vmatprep.subr.bf16.mxu0 %v1896_v17  ;;  %1080 = vmatpush1.bf16.msra.mxu1 %v1913_v22  ;;  %v1948_v54 = vld [vmem:[%s2815_s28 + $0x1a0] ss:$16 sps:$4 sm:$0xff]   ;;  %v1950_v55 = vld [vmem:[%s2815_s28 + $0x1c4] ss:$16 sps:$4 sm:$0xff]   ;;  %v1961_v56 = vld [vmem:[%s2815_s28 + $0x188] ss:$16 sps:$4 sm:$0xff]  }
 0x1ae   : > { %1081 = vmatprep.subr.bf16.mxu1 %v1916_v23  ;;  %v1962_v57 = vld [vmem:[%s2815_s28 + $0x1ac] ss:$16 sps:$4 sm:$0xff]   ;;  %v1954_v58 = vld [vmem:[%s2815_s28 + $0x1c0] ss:$16 sps:$4 sm:$0xff]   ;;  %v1956_v59 = vld [vmem:[%s2815_s28 + $0x1e4] ss:$16 sps:$4 sm:$0xff]  }
 0x1af   : > { %v1964_v60 = vld [vmem:[%s2815_s28 + $0x1a8] ss:$16 sps:$4 sm:$0xff]   ;;  %v1965_v61 = vld [vmem:[%s2815_s28 + $0x1cc] ss:$16 sps:$4 sm:$0xff]   ;;  %v1960_v62 = vld [vmem:[%s2815_s28 + $0x1e0] ss:$16 sps:$4 sm:$0xff]  }
 0x1b0   : > { %1041 = vmatpush1.bf16.msra.mxu0 %v1900_v20  ;;  %v1967_v0 = vld [vmem:[%s2815_s28 + $0x1c8] ss:$16 sps:$4 sm:$0xff]   ;;  %v1968_v1 = vld [vmem:[%s2815_s28 + $0x1ec] ss:$16 sps:$4 sm:$0xff]   ;;  %v692_v6 = vsub.s32 0, %v691_v5  ;;  %v696_v8 = vsub.s32 1, %v691_v5 }
 0x1b1   : > { %1042 = vmatprep.subr.bf16.mxu0 %v1902_v21  ;;  %1082 = vmatpush1.bf16.msra.mxu1 %v1919_v26  ;;  %v1970_v3 = vld [vmem:[%s2815_s28 + $0x1e8] ss:$16 sps:$4 sm:$0xff]   ;;  %v704_v11 = vsub.s32 3, %v691_v5  ;;  %v700_v21 = vsub.s32 2, %v691_v5  ;;  %vm2533_vm0 = vmmov (!%p1690_p3), 0  }
 0x1b2   : > { %1083 = vmatprep.subr.bf16.mxu1 %v1922_v27  ;;  %v693_v9 = vrot.slane %v688_v7, %v692_v6  ;;  %v697_v10 = vrot.slane %v688_v7, %v696_v8 }
 0x1b3   : > { %v705_v19 = vrot.slane %v688_v7, %v704_v11  ;;  %v701_v26 = vrot.slane %v688_v7, %v700_v21 }
 0x1b4   : > { %1043 = vmatpush1.bf16.msra.mxu0 %v1906_v24 }
 0x1b5   : > { %1044 = vmatprep.subr.bf16.mxu0 %v1908_v25  ;;  %1084 = vmatpush1.bf16.msra.mxu1 %v1925_v30 }
 0x1b6   : > { %1085 = vmatprep.subr.bf16.mxu1 %v1928_v31 }
 0x1b8   : > { %1045 = vmatpush1.bf16.msra.mxu0 %v1912_v28 }
 0x1b9   : > { %1046 = vmatprep.subr.bf16.mxu0 %v1914_v29  ;;  %1086 = vmatpush1.bf16.msra.mxu1 %v1931_v34 }
 0x1ba   : > { %1087 = vmatprep.subr.bf16.mxu1 %v1934_v35 }
 0x1bc   : > { %1047 = vmatpush1.bf16.msra.mxu0 %v1918_v32 }
 0x1bd   : > { %1048 = vmatprep.subr.bf16.mxu0 %v1920_v33  ;;  %1088 = vmatpush1.bf16.msra.mxu1 %v1937_v38 }
 0x1be   : > { %1089 = vmatprep.subr.bf16.mxu1 %v1940_v39 }
 0x1c0   : > { %1049 = vmatpush1.bf16.msra.mxu0 %v1924_v36  ;;  %v621_v36 = vld [vmem:[%s2844_s10] sm:$0xff] }
 0x1c1   : > { %1050 = vmatprep.subr.bf16.mxu0 %v1926_v37  ;;  %1090 = vmatpush1.bf16.msra.mxu1 %v1943_v44 }
 0x1c2   : > { %1091 = vmatprep.subr.bf16.mxu1 %v1946_v45 }
 0x1c4   : > { %1051 = vmatpush1.bf16.msra.mxu0 %v1930_v41 }
 0x1c5   : > { %1052 = vmatprep.subr.bf16.mxu0 %v1932_v43  ;;  %1092 = vmatpush1.bf16.msra.mxu1 %v1949_v48  ;;  %v1988_v48 = vld [vmem:[#allocation12 + $0x8] sm:$0xff] (!%p1690_p3)  }
 0x1c6   : > { %1093 = vmatprep.subr.bf16.mxu1 %v1952_v49  ;;  %v1989_v49 = vld [vmem:[#allocation12 + $0x10] sm:$0xff] (!%p1690_p3)  }
 0x1c8   : > { %1053 = vmatpush1.bf16.msra.mxu0 %v1936_v46  ;;  %v1987_v46 = vld [vmem:[#allocation12] sm:$0xff] (!%p1690_p3)  }
 0x1c9   : > { %1054 = vmatprep.subr.bf16.mxu0 %v1938_v47  ;;  %1094 = vmatpush1.bf16.msra.mxu1 %v1955_v52  ;;  %v2532_v47 = vmov (!%p1690_p3), 0.0   ;;  %v1992_v52 = vld [vmem:[#allocation12 + $0x28] sm:$0xff] (!%p1690_p3)  }
 0x1ca   : > { %1095 = vmatprep.subr.bf16.mxu1 %v1958_v53  ;;  %v1993_v53 = vld [vmem:[#allocation12 + $0x30] sm:$0xff] (!%p1690_p3)  }
 0x1cc   : > { %1055 = vmatpush1.bf16.msra.mxu0 %v1942_v50  ;;  %v1990_v50 = vld [vmem:[#allocation12 + $0x18] sm:$0xff] (!%p1690_p3)  }
 0x1cd   : > { %1056 = vmatprep.subr.bf16.mxu0 %v1944_v51  ;;  %1096 = vmatpush1.bf16.msra.mxu1 %v1961_v56  ;;  %v1991_v51 = vld [vmem:[#allocation12 + $0x20] sm:$0xff] (!%p1690_p3)   ;;  %v1691_v56 = vld [vmem:[%s3270_s7] ss:$0 sm:$0xff] (!%p1690_p3) }
 0x1ce   : > { %1097 = vmatprep.subr.bf16.mxu1 %v1962_v57 }
 0x1d0   : > { %1057 = vmatpush1.bf16.msra.mxu0 %v1948_v54  ;;  %v1994_v54 = vld [vmem:[#allocation12 + $0x38] sm:$0xff] (!%p1690_p3)  }
 0x1d1   : > { %1058 = vmatprep.subr.bf16.mxu0 %v1950_v55  ;;  %1098 = vmatpush1.bf16.msra.mxu1 %v1964_v60 }
 0x1d2   : > { %1099 = vmatprep.subr.bf16.mxu1 %v1965_v61 }
 0x1d4   : > { %1059 = vmatpush1.bf16.msra.mxu0 %v1954_v58 }
 0x1d5   : > { %1060 = vmatprep.subr.bf16.mxu0 %v1956_v59  ;;  %1100 = vmatpush1.bf16.msra.mxu1 %v1967_v0 }
 0x1d6   : > { %1101 = vmatprep.subr.bf16.mxu1 %v1968_v1 }
 0x1d8   : > { %1061 = vmatpush1.bf16.msra.mxu0 %v1960_v62 }
 0x1d9   : > { %1102 = vmatpush1.bf16.msra.mxu1 %v1970_v3  ;;  %1743 = vmatprep.subr.bf16.mxu0 (!%p1690_p3), %v2532_v47 }
 0x1db   : > { %1063 = vmatmul.mubr.bf16.vlgmr.msra.gmra.mrb[0].mxu0 %v622_v2 }
 0x1dc   : > { %1104 = vmatmul.mubr.bf16.vlgmr.msra.gmra.mrb[0].mxu1 %v622_v2  ;;  %1744 = vmatpush3.bf16.msra.mxu0 (!%p1690_p3), %v1987_v46 }
 0x1dd   : > { %1759 = vmatprep.mubr.msk.bf16.mxu0 (!%p1690_p3), %vm2533_vm0, %v2532_v47  ;;  %1745 = vmatprep.subr.bf16.mxu0 (!%p1690_p3), %v2532_v47 }
 0x1e0   : > { %1746 = vmatpush3.bf16.msra.mxu0 (!%p1690_p3), %v1988_v48 }
 0x1e1   : > { %1747 = vmatprep.subr.bf16.mxu0 (!%p1690_p3), %v2532_v47 }
 0x1e4   : > { %1748 = vmatpush3.bf16.msra.mxu0 (!%p1690_p3), %v1989_v49 }
 0x1e5   : > { %1749 = vmatprep.subr.bf16.mxu0 (!%p1690_p3), %v2532_v47 }
 0x1e8   : > { %1750 = vmatpush3.bf16.msra.mxu0 (!%p1690_p3), %v1990_v50 }
 0x1e9   : > { %1751 = vmatprep.subr.bf16.mxu0 (!%p1690_p3), %v2532_v47 }
 0x1ec   : > { %1752 = vmatpush3.bf16.msra.mxu0 (!%p1690_p3), %v1991_v51 }
 0x1ed   : > { %1753 = vmatprep.subr.bf16.mxu0 (!%p1690_p3), %v2532_v47 }
 0x1f0   : > { %1754 = vmatpush3.bf16.msra.mxu0 (!%p1690_p3), %v1992_v52 }
 0x1f1   : > { %1755 = vmatprep.subr.bf16.mxu0 (!%p1690_p3), %v2532_v47 }
 0x1f4   : > { %1756 = vmatpush3.bf16.msra.mxu0 (!%p1690_p3), %v1993_v53 }
 0x1f5   : > { %1757 = vmatprep.subr.bf16.mxu0 (!%p1690_p3), %v2532_v47 }
 0x1f8   : > { %1758 = vmatpush3.bf16.msra.mxu0 (!%p1690_p3), %v1994_v54 }
 0x2ae   : > { %v1064_v12 = vpop.f32.mrb[0].mxu0 }
 0x2af   : > { %v1065_v13 = vadd.f32 %v1064_v12, %v693_v9  ;;  %v1066_v14 = vpop.f32.mrb[1].mxu0  ;;  %v1105_v22 = vpop.f32.mrb[0].mxu1 }
 0x2b0   : > { %v1067_v15 = vadd.f32 %v1066_v14, %v697_v10  ;;  %v1068_v16 = vpop.f32.mrb[2].mxu0  ;;  %v1107_v23 = vpop.f32.mrb[1].mxu1  ;;  %v1106_v29 = vadd.f32 %v1105_v22, %v701_v26 }
 0x2b1   : > { %v1687_v17 = vmul.f32 -1.442695, %v1065_v13  ;;  %v1069_v18 = vpop.f32.mrb[3].mxu0  ;;  %v1108_v24 = vadd.f32 %v1107_v23, %v705_v19  ;;  %v1109_v25 = vpop.f32.mrb[2].mxu1 }
 0x2b2   : > { %v1688_v20 = vmul.f32 -1.442695, %v1067_v15  ;;  %v1110_v27 = vpop.f32.mrb[3].mxu1 }
 0x2b3   : > { %1971 = vpow2.f32 %v1687_v17  ;;  %v1689_v28 = vmul.f32 -1.442695, %v1108_v24 }
 0x2b4   : > { %1973 = vpow2.f32 %v1688_v20 }
 0x2b5   : > { %1975 = vpow2.f32 %v1689_v28 }
 0x2b6   : > { %1977 = vtanh.f32 %v1106_v29 }
 0x2bd   : > { %v1972_v30 = vpop.eup %1971 }
 0x2be   : > { %v1974_v31 = vpop.eup %1973  ;;  %v1115_v32 = vadd.f32 1.0, %v1972_v30 }
 0x2bf   : > { %v1121_v33 = vadd.f32 1.0, %v1974_v31  ;;  %v1976_v34 = vpop.eup %1975 }
 0x2c0   : > { %1979 = vrcp.f32 %v1115_v32  ;;  %v1978_v35 = vpop.eup %1977  ;;  %v1128_v38 = vadd.f32 1.0, %v1976_v34 }
 0x2c1   : > { %1981 = vrcp.f32 %v1121_v33 }
 0x2c2   : > { %1983 = vrcp.f32 %v1128_v38 }
 0x2ca   : > { %v1980_v37 = vpop.eup %1979 }
 0x2cb   : > { %v1982_v39 = vpop.eup %1981  ;;  %v1132_v40 = vmul.f32 %v1980_v37, %v1978_v35 }
 0x2cc   : > { %v1131_v41 = vmul.f32 %v1982_v39, %v621_v36  ;;  %v1984_v43 = vpop.eup %1983 }
 0x2ce   : > { %v1133_v42 = vadd.f32 %v1132_v40, %v1131_v41 }
 0x2d0   : > { %1985 = vtanh.f32 %v1133_v42  ;;  %1137 = vst [vmem:[%s435_s20] sm:$0xff] %v1133_v42 }
 0x2d7   : > { %1142 = sbr.rel (%p1690_p3) target bundleno = 950 (0x3b6), region = 100 }
 0x2da   : > { %v1986_v44 = vpop.eup %1985 }
 0x2db   : > { %v1135_v45 = vmul.f32 %v1986_v44, %v1984_v43 }
 0x2dd   : > { %1136 = vst [vmem:[%s428_s8] sm:$0xff] %v1135_v45  ;;  %1138 = vst [vmem:[#allocation2] sm:$0xff] %v1135_v45  ;;  %v1143_v55 = vpack.c.bf16 (!%p1690_p3), %v1135_v45, %v1135_v45 }
 0x2df   : > { %1760 = vmatmul.mubr.bf16.vlgmr.msra.gmra.mrb[0].mxu0 %v1143_v55 }
 0x3b2   : > { %v1249_v57 = vpop.f32.mrb[0].mxu0 }
 0x3b3   : > { %v1250_v58 = vadd.f32 %v1691_v56, %v1249_v57  ;;  %v1761_v59 = vpop.f32.mrb[1].mxu0 }
 0x3b4   : > { %v1252_v60 = vpop.f32.mrb[2].mxu0 }
 0x3b5   : > { %1255 = vst [vmem:[#allocation14] sm:$0xff] %v1250_v58  ;;  %v1762_v61 = vpop.f32.mrb[3].mxu0 }
 0x3b6 PF: > { %s1703_s10 = sshll.u32 %s2689_s21, 7  ;;  %s3367_s2 = sld [smem:[#allocation58_spill]] }
 0x3b7   : > { %s1286_s22 = sshll.u32 %s428_s8, 4  ;;  %s3368_s12 = sand.u32 1, %s2689_s21   ;;  %s1287_s22 = int_to_ptr.vmem [resolvable:$true] %s1286_s22 }
 0x3b8   : > { %s3175_s14 = scalar_lea.sflag [#allocation16], %s3368_s12  ;;  %s2347_s13 = scalar_lea.vmem %s1287_s22, 128 }
 0x3b9   : > { %p2348_p9 = scmp.ne.s32.totalorder %s1287_s22, %s2347_s13  ;;  %p3369_p0 = scmp.ne.s32.totalorder %s3307_s17, 0 }
 0x3ba   : > { %s2534_s9 = smov [#allocation15]  }
 0x3bb   : > { %p2349_p5 = pnand %p2348_p9, %p3369_p0  ;;  %s2351_s0 = sshll.u32 %s2534_s9, 4  ;;  %s2352_s0 = int_to_ptr.vmem [resolvable:$false] %s2351_s0 }
 0x3bc   : > { %s3169_s15 = scalar_lea.hbm %s3367_s2, %s1703_s10  ;;  %s2353_s19 = scalar_lea.vmem %s2352_s0, 256 }
 0x3bd   : > { %p2350_p6 = pneg %p2349_p5  ;;  %p2354_p11 = scmp.lt.s32.totalorder %s1287_s22, %s2352_s0 }
 0x3be   : > { %p2355_p13 = scmp.lt.s32.totalorder %s2353_s19, %s2347_s13 }
 0x3c0   : > { %p2356_p10 = por %p2355_p13, %p2354_p11 }
 0x3c2   : > { %p2357_p4 = pnand %p2356_p10, %p2350_p6 }
 0x3c4   : > { %2360 = shalt.err (!%p2357_p4)
}
 0x3c5   : > { %s2361_s16 = scalar_lea.hbm %s3169_s15, 128  ;;  %s2365_s4 = scalar_lea.hbm %s3367_s2, 256 }
 0x3c6   : > { %p2362_p2 = scmp.ne.s32.totalorder %s3169_s15, %s2361_s16  ;;  %p2366_p1 = scmp.lt.u32.totalorder %s3169_s15, %s3367_s2 }
 0x3c7   : > { %p2367_p12 = scmp.lt.u32.totalorder %s2365_s4, %s2361_s16  ;;  %p2369_p9 = scmp.lt.u32.totalorder %s2361_s16, %s3169_s15 }
 0x3c8   : > { %p2363_p7 = pnand %p2362_p2, %p3369_p0 }
 0x3c9   : > { %p2368_p3 = por %p2367_p12, %p2366_p1 }
 0x3ca   : > { %p2364_p8 = pneg %p2363_p7 }
 0x3cb   : > { %p2370_p5 = por %p2369_p9, %p2368_p3 }
 0x3cd   : > { %p2371_p6 = pnand %p2370_p5, %p2364_p8 }
 0x3cf   : > { %2374 = shalt.err (!%p2371_p6)
}
 0x3d0   : > { %1792 = dma.vmem_to_hbm [thread:$0]  (%p3369_p0), %s1287_s22, 128, %s3169_s15, %s3175_s14  }
 0x3d1   : > { %s2535_s11 = smov [#allocation14]   ;;  %s3370_s18 = sld [smem:[#allocation59_spill]] }
 0x3d2   : > { %s1273_s28 = sshll.u32 %s2535_s11, 4  ;;  %s1299_s13 = sshll.u32 %s435_s20, 4  ;;  %s1274_s28 = int_to_ptr.vmem [resolvable:$true] %s1273_s28  ;;  %s1300_s13 = int_to_ptr.vmem [resolvable:$true] %s1299_s13 }
 0x3d3   : > { %s2375_s9 = scalar_lea.vmem %s1274_s28, 128  ;;  %p3371_p13 = scmp.eq.s32.totalorder %s2689_s21, 1 }
 0x3d4   : > { %p2376_p11 = scmp.ne.s32.totalorder %s1274_s28, %s2375_s9  ;;  %p2382_p2 = scmp.lt.s32.totalorder %s1274_s28, %s1274_s28 }
 0x3d5   : > { %p2383_p7 = scmp.lt.s32.totalorder %s2375_s9, %s2375_s9 }
 0x3d6   : > { %p2377_p10 = pnand %p2376_p11, %p3371_p13 }
 0x3d7   : > { %s3200_s12 = scalar_lea.hbm %s3370_s18, %s1703_s10  ;;  %p2384_p8 = por %p2383_p7, %p2382_p2 }
 0x3d8   : > { %p2378_p4 = pneg %p2377_p10 }
 0x3da   : > { %p2385_p1 = pnand %p2384_p8, %p2378_p4 }
 0x3dc   : > { %2388 = shalt.err (!%p2385_p1)
}
 0x3dd   : > { %s3372_s0 = sld [smem:[#allocation57_spill]]  ;;  %p3373_p3 = pmov %p3371_p13 }
 0x3e3   : > { %s2389_s19 = scalar_lea.hbm %s3372_s0, 128 }
 0x3e4   : > { %p2390_p12 = scmp.ne.s32.totalorder %s3372_s0, %s2389_s19  ;;  %p2395_p6 = scmp.lt.u32.totalorder %s2389_s19, %s3372_s0 }
 0x3e6   : > { %p2391_p9 = pnand %p2390_p12, %p3373_p3 }
 0x3e8   : > { %p2392_p5 = pneg %p2391_p9 }
 0x3ea   : > { %p2397_p11 = pnand %p2395_p6, %p2392_p5 }
 0x3ec   : > { %2400 = shalt.err (!%p2397_p11)
}
 0x3ed   : > { %p3374_p13 = pmov %p3373_p3  ;;  %s2401_s4 = scalar_lea.vmem %s1300_s13, 128 }
 0x3ee   : > { %p2402_p10 = scmp.ne.s32.totalorder %s1300_s13, %s2401_s4  ;;  %s2536_s25 = smov [#allocation17]  }
 0x3ef   : > { %1791 = dma.vmem_to_hbm [thread:$0]  (%p3374_p13), %s1274_s28, 128, %s3372_s0, [#allocation8]  }
 0x3f0   : > { %p2403_p4 = pnand %p2402_p10, %p3369_p0  ;;  %s2405_s8 = sshll.u32 %s2536_s25, 4  ;;  %s2406_s8 = int_to_ptr.vmem [resolvable:$false] %s2405_s8 }
 0x3f1   : > { %s2407_s11 = scalar_lea.vmem %s2406_s8, 256  ;;  %p2408_p7 = scmp.lt.s32.totalorder %s1300_s13, %s2406_s8 }
 0x3f2   : > { %p2404_p2 = pneg %p2403_p4  ;;  %p2409_p8 = scmp.lt.s32.totalorder %s2407_s11, %s2401_s4 }
 0x3f4   : > { %p2410_p1 = por %p2409_p8, %p2408_p7 }
 0x3f6   : > { %p2411_p12 = pnand %p2410_p1, %p2404_p2 }
 0x3f8   : > { %2414 = shalt.err (!%p2411_p12)
}
 0x3f9   : > { %s2415_s28 = scalar_lea.hbm %s3200_s12, 128  ;;  %s2419_s9 = scalar_lea.hbm %s3370_s18, 256 }
 0x3fa   : > { %p2416_p3 = scmp.ne.s32.totalorder %s3200_s12, %s2415_s28  ;;  %p2420_p6 = scmp.lt.u32.totalorder %s3200_s12, %s3370_s18 }
 0x3fb   : > { %p2421_p11 = scmp.lt.u32.totalorder %s2419_s9, %s2415_s28  ;;  %p2423_p10 = scmp.lt.u32.totalorder %s2415_s28, %s3200_s12 }
 0x3fc   : > { %p2417_p9 = pnand %p2416_p3, %p3369_p0 }
 0x3fd   : > { %p2422_p13 = por %p2421_p11, %p2420_p6 }
 0x3fe   : > { %p2418_p5 = pneg %p2417_p9 }
 0x3ff   : > { %p2424_p4 = por %p2423_p10, %p2422_p13 }
 0x401   : > { %p2425_p2 = pnand %p2424_p4, %p2418_p5 }
 0x403   : > { %2428 = shalt.err (!%p2425_p2)
}
 0x404   : > { %1793 = dma.vmem_to_hbm [thread:$0]  (%p3369_p0), %s1300_s13, 128, %s3200_s12, %s3175_s14  }
 0x405   : > { %p3375_p7 = scmp.eq.s32.totalorder %s2689_s21, 1 }
 0x407   : > { %2492 = dma.done.wait (%p3375_p7), [#allocation8], 128   ;;  %p3376_p8 = pmov %p3375_p7 }
 0x409   : > { %2494 = vsyncadd (%p3376_p8), [#allocation8], 4294967168 }
 0x40a PF: > { %s3377_s19 = sadd.s32 4294967294, %s2513_s26   ;;  %s3378_s10 = sld [smem:[#allocation53_spill]] }
 0x40b   : > { %s1315_s16 = sand.u32 1, %s3377_s19   ;;  %p3380_p12 = scmp.ge.s32.totalorder %s2513_s26, 2 }
 0x40c   : > { %s1316_s29 = scalar_lea.sflag [#allocation16], %s1315_s16 }
 0x410   : > { %p3379_p1 = scmp.ne.s32.totalorder %s3378_s10, 0 }
 0x412   : > { %p1813_p3 = pnand %p3380_p12, %p3379_p1 }
 0x414   : > { %2496 = dma.done.wait (!%p1813_p3), %s1316_s29, 256  }
 0x415   : > { %2498 = vsyncadd (!%p1813_p3), %s1316_s29, 4294967040  ;;  %s3381_s26 = sld [smem:[#allocation51_spill]]  ;;  %s3382_s17 = sld [smem:[#allocation50_spill]] }
 0x416   : > { %s3383_s25 = sld [smem:[#allocation52_spill]]  ;;  %s3384_s23 = smov %s2505_s24 }
 0x41b   : > { %p33_p0 = scmp.ge.s32.totalorder %s3381_s26, 4   ;;  %s3385_s24 = smov %s3382_s17 }
 0x41d   :  { %35 = sbr.rel (!%p33_p0) target bundleno = 22 (0x16), region = 213 }
 0x424   :  { %1330 = vsyncpa [#allocation7], 1 }
 0x425   :  { %1332 = vsyncpa [#allocation7 + $0x1], 1 }
 0x426   :  { %1333 = vsyncpa [#allocation10], 1 }
 0x427   :  { %1335 = vsyncpa [#allocation10 + $0x1], 1 }
 0x428   :  { %1336 = vsyncpa [#allocation13], 1 }
 0x429   :  { %1337 = vsyncpa [#allocation8], 1 }
 0x42a   :  { %1339 = vsyncpa [#allocation8 + $0x1], 1 }
 0x42b   :  { %1340 = vsyncpa [#allocation16], 1 }
 0x42c   :  { %1342 = vsyncpa [#allocation16 + $0x1], 1 }
 0x42d   :  { %1343 = vsyncmov [#allocation3] }
 0x430   :  { %s1344_s21 = vpop.sfrf %1343 }
 0x431   :  { %p1708_p9 = scmp.ne.s32.totalorder %s1344_s21, 0 }
 0x433   :  { %1348 = shalt.err (%p1708_p9)  }
 0x434   :  { %1350 = vsyncmov [#allocation3 + $0x1] }
 0x437   :  { %s1351_s14 = vpop.sfrf %1350 }
 0x438   :  { %p1709_p5 = scmp.ne.s32.totalorder %s1351_s14, 0 }
 0x43a   :  { %1355 = shalt.err (%p1709_p5)  }
 0x43b   :  { %1357 = vsyncmov [#allocation3 + $0x2] }
 0x43e   :  { %s1358_s26 = vpop.sfrf %1357 }
 0x43f   :  { %p1710_p6 = scmp.ne.s32.totalorder %s1358_s26, 0 }
 0x441   :  { %1362 = shalt.err (%p1710_p6)  }
 0x442   :  { %1364 = vsyncmov [#allocation3 + $0x3] }
 0x445   :  { %s1365_s1 = vpop.sfrf %1364 }
 0x446   :  { %p1711_p11 = scmp.ne.s32.totalorder %s1365_s1, 0 }
 0x448   :  { %1369 = shalt.err (%p1711_p11)  }
 0x449   :  { %1371 = vsyncmov [#allocation3 + $0x4] }
 0x44c   :  { %s1372_s5 = vpop.sfrf %1371 }
 0x44d   :  { %p1712_p13 = scmp.ne.s32.totalorder %s1372_s5, 0 }
 0x44f   :  { %1376 = shalt.err (%p1712_p13)  }
 0x450   :  { %1378 = vsyncmov [#allocation3 + $0x5] }
 0x453   :  { %s1379_s6 = vpop.sfrf %1378 }
 0x454   :  { %p1713_p10 = scmp.ne.s32.totalorder %s1379_s6, 0 }
 0x456   :  { %1383 = shalt.err (%p1713_p10)  }
 0x457   :  { %1385 = vsyncmov [#allocation3 + $0x6] }
 0x45a   :  { %s1386_s7 = vpop.sfrf %1385 }
 0x45b   :  { %p1714_p4 = scmp.ne.s32.totalorder %s1386_s7, 0 }
 0x45d   :  { %1390 = shalt.err (%p1714_p4)  }
 0x45e   :  { %1392 = vsyncmov [#allocation3 + $0x7] }
 0x461   :  { %s1393_s24 = vpop.sfrf %1392 }
 0x462   :  { %p1715_p2 = scmp.ne.s32.totalorder %s1393_s24, 0 }
 0x464   :  { %1397 = shalt.err (%p1715_p2)  }

</bundles_post_ra>
